<compile_context>
chip_gen: v7x
topology: tpu7x:2x2x1
jax: 0.10.0
libtpu: 0.0.40
codegen_flags: <defaults>
</compile_context>

<pallas_src>
import jax
import jax.numpy as jnp
from jax.experimental import pallas as pl
from jax.experimental.pallas import tpu as pltpu


def lstm_fc_kernel(tokens_ref, emb_proj_ref, whh_ref, wfc_ref, bfc_ref,
                   out_ref, xp_ref):
    """Single-invocation kernel: fused gather + LSTM recurrence + FC.

    tokens_ref:   SMEM (B, T) int32  scalar-prefetched token ids
    emb_proj_ref: VMEM (Vp, 4H)      rows = embedding @ W_ih^T + (b_ih + b_hh)
    whh_ref:      VMEM (H, 4H)       W_hh^T
    wfc_ref:      VMEM (H, Op)       W_fc^T (lane-padded output dim)
    bfc_ref:      VMEM (1, Op)
    out_ref:      VMEM (Bp, Op)      logits (padded)
    xp_ref:       VMEM (T, Bp, 4H)   scratch: per-step gate pre-activations
    """
    T, Bp, G = xp_ref.shape
    H = whh_ref.shape[0]
    B = tokens_ref.shape[0]

    # Zero the scratch so padded batch rows carry benign values (rows are
    # independent through the recurrence; padded rows are sliced off outside).
    xp_ref[...] = jnp.zeros_like(xp_ref)

    # Fused embedding lookup + input projection + bias: gather precomputed
    # rows of emb_proj.  Static (b, t) Python loops (tiny), dynamic row index.
    for b in range(B):
        for t in range(T):
            tok = tokens_ref[b, t]
            xp_ref[t, b:b + 1, :] = emb_proj_ref[pl.ds(tok, 1), :]

    w_hh = whh_ref[...]  # loop-invariant, resident in vregs/VMEM

    def step(t, carry):
        h, c = carry
        # gates = (x_t @ W_ih^T + b) + h @ W_hh^T   (PyTorch gate order i,f,g,o)
        gates = xp_ref[t] + jnp.dot(h, w_hh, preferred_element_type=jnp.float32)
        i_g = jax.nn.sigmoid(gates[:, 0 * H:1 * H])
        f_g = jax.nn.sigmoid(gates[:, 1 * H:2 * H])
        g_g = jnp.tanh(gates[:, 2 * H:3 * H])
        o_g = jax.nn.sigmoid(gates[:, 3 * H:4 * H])
        c_new = f_g * c + i_g * g_g
        h_new = o_g * jnp.tanh(c_new)
        return (h_new, c_new)

    h0 = jnp.zeros((Bp, H), jnp.float32)
    c0 = jnp.zeros((Bp, H), jnp.float32)
    # Full unroll only while T is tiny; cap the unroll factor for longer seqs
    # to keep vreg live ranges bounded.
    h_last, _ = jax.lax.fori_loop(0, T, step, (h0, c0), unroll=min(T, 8))

    # Final Linear on the last hidden state; output is lane-dense.
    out_ref[...] = (jnp.dot(h_last, wfc_ref[...],
                            preferred_element_type=jnp.float32)
                    + bfc_ref[...]).astype(out_ref.dtype)


def _pad_axis(x, target, axis):
    pad = target - x.shape[axis]
    if pad <= 0:
        return x
    cfg = [(0, 0)] * x.ndim
    cfg[axis] = (0, pad)
    return jnp.pad(x, cfg)


def prepare_params(params):
    """One-time parameter preparation (hoisted out of the per-forward path).

    Fuses the embedding table with the LSTM input projection and pads weights
    to sublane/lane-dense shapes.
    """
    SUBLANE, LANE = 8, 128
    # emb_proj[v] = embedding[v] @ W_ih^T + (b_ih + b_hh)   -> (V, 4H)
    emb_proj = (jnp.dot(params["embedding"], params["w_ih_t"],
                        preferred_element_type=jnp.float32) + params["b"])
    V = emb_proj.shape[0]
    Vp = ((V + SUBLANE - 1) // SUBLANE) * SUBLANE
    O = params["w_fc_t"].shape[1]
    Op = ((O + LANE - 1) // LANE) * LANE
    return {
        "emb_proj": _pad_axis(emb_proj, Vp, 0),          # (Vp, 4H)
        "w_hh_t": params["w_hh_t"],                      # (H, 4H)
        "w_fc_t": _pad_axis(params["w_fc_t"], Op, 1),    # (H, Op)
        "b_fc": _pad_axis(params["b_fc"], Op, 1),        # (1, Op)
        "output_dim": O,
    }


def text_classifier_forward(tokens, prep):
    """tokens: int32 (B, T). prep: output of prepare_params.
    Returns logits (B, output_dim) float32."""
    B, T = tokens.shape
    emb_proj = prep["emb_proj"]                 # (Vp, 4H)
    w_hh = prep["w_hh_t"]                       # (H, 4H)
    w_fc = prep["w_fc_t"]                       # (H, Op)
    b_fc = prep["b_fc"]                         # (1, Op)
    O = prep["output_dim"]

    Vp, G = emb_proj.shape
    H = w_hh.shape[0]
    Op = w_fc.shape[1]

    SUBLANE = 8
    Bp = ((B + SUBLANE - 1) // SUBLANE) * SUBLANE

    grid_spec = pltpu.PrefetchScalarGridSpec(
        num_scalar_prefetch=1,                  # tokens -> SMEM
        grid=(1,),                              # single invocation
        in_specs=[
            pl.BlockSpec((Vp, G), lambda i, tok: (0, 0)),   # emb_proj
            pl.BlockSpec((H, G), lambda i, tok: (0, 0)),    # W_hh^T
            pl.BlockSpec((H, Op), lambda i, tok: (0, 0)),   # W_fc^T
            pl.BlockSpec((1, Op), lambda i, tok: (0, 0)),   # b_fc
        ],
        out_specs=pl.BlockSpec((Bp, Op), lambda i, tok: (0, 0)),
        scratch_shapes=[
            pltpu.VMEM((T, Bp, G), jnp.float32),            # gate pre-activations
        ],
    )

    out = pl.pallas_call(
        lstm_fc_kernel,
        out_shape=jax.ShapeDtypeStruct((Bp, Op), jnp.float32),
        grid_spec=grid_spec,
        compiler_params=pltpu.CompilerParams(
            dimension_semantics=("arbitrary",)),
    )(tokens, emb_proj, w_hh, w_fc, b_fc)

    return out[:B, :O]


def reference_forward(tokens, params):
    """Pure-JAX reference of the PyTorch module semantics."""
    emb = params["embedding"][tokens]            # (B, T, E)
    B, T, E = emb.shape
    H = params["w_hh_t"].shape[0]

    def step(carry, x_t):
        h, c = carry
        gates = x_t @ params["w_ih_t"] + h @ params["w_hh_t"] + params["b"]
        i = jax.nn.sigmoid(gates[:, 0 * H:1 * H])
        f = jax.nn.sigmoid(gates[:, 1 * H:2 * H])
        g = jnp.tanh(gates[:, 2 * H:3 * H])
        o = jax.nn.sigmoid(gates[:, 3 * H:4 * H])
        c = f * c + i * g
        h = o * jnp.tanh(c)
        return (h, c), None

    h0 = jnp.zeros((B, H), jnp.float32)
    c0 = jnp.zeros((B, H), jnp.float32)
    (h_last, _), _ = jax.lax.scan(step, (h0, c0), jnp.transpose(emb, (1, 0, 2)))
    return h_last @ params["w_fc_t"] + params["b_fc"]


def init_params(key, vocab_size, embedding_dim, hidden_dim, output_dim):
    ks = jax.random.split(key, 6)
    scale = 0.1
    return {
        "embedding": scale * jax.random.normal(ks[0], (vocab_size, embedding_dim), jnp.float32),
        # stored pre-transposed relative to PyTorch (weight_ih: (4H,E) -> (E,4H))
        "w_ih_t": scale * jax.random.normal(ks[1], (embedding_dim, 4 * hidden_dim), jnp.float32),
        "w_hh_t": scale * jax.random.normal(ks[2], (hidden_dim, 4 * hidden_dim), jnp.float32),
        "b": scale * jax.random.normal(ks[3], (1, 4 * hidden_dim), jnp.float32),  # b_ih + b_hh
        "w_fc_t": scale * jax.random.normal(ks[4], (hidden_dim, output_dim), jnp.float32),
        "b_fc": scale * jax.random.normal(ks[5], (1, output_dim), jnp.float32),
    }


if __name__ == "__main__":
    # Small shapes consistent with the module's forward.
    vocab_size = 50
    embedding_dim = 100
    hidden_dim = 128
    output_dim = 2
    batch = 2
    seq_len = 8

    key = jax.random.PRNGKey(0)
    k_tok, k_par = jax.random.split(key)
    tokens = jax.random.randint(k_tok, (batch, seq_len), 0, vocab_size, dtype=jnp.int32)
    params = init_params(k_par, vocab_size, embedding_dim, hidden_dim, output_dim)

    prep = prepare_params(params)                       # one-time prep (hoisted)
    logits = text_classifier_forward(tokens, prep)
    logits = jax.block_until_ready(logits)

    ref = jax.block_until_ready(reference_forward(tokens, params))
    assert logits.shape == (batch, output_dim)
    assert jnp.allclose(logits, ref, atol=1e-4, rtol=1e-4)

    print("KERNEL_OK")
</pallas_src>

<mosaic_0001>
module attributes {stable_mosaic.version = 11 : i64} {
  func.func @lstm_fc_kernel(%arg0: i32, %arg1: memref<2x8xi32, #tpu.memory_space<smem>>, %arg2: memref<56x512xf32, #tpu.memory_space<vmem>>, %arg3: memref<128x512xf32, #tpu.memory_space<vmem>>, %arg4: memref<128x128xf32, #tpu.memory_space<vmem>>, %arg5: memref<1x128xf32, #tpu.memory_space<vmem>>, %arg6: memref<8x128xf32, #tpu.memory_space<vmem>>, %arg7: memref<8x8x512xf32, #tpu.memory_space<vmem>>) attributes {dimension_semantics = [#tpu.dimension_semantics<arbitrary>], iteration_bounds = array<i64: 1>, scalar_prefetch = 1 : i64, scratch_operands = 1 : i64, tpu.core_type = #tpu.core_type<tc>, window_params = [{pipeline_mode = #tpu.pipeline_mode<synchronous>, transform_indices = @transform_0, window_bounds = array<i64: 56, 512>}, {pipeline_mode = #tpu.pipeline_mode<synchronous>, transform_indices = @transform_1, window_bounds = array<i64: 128, 512>}, {pipeline_mode = #tpu.pipeline_mode<synchronous>, transform_indices = @transform_2, window_bounds = array<i64: 128, 128>}, {pipeline_mode = #tpu.pipeline_mode<synchronous>, transform_indices = @transform_3, window_bounds = array<i64: 1, 128>}, {pipeline_mode = #tpu.pipeline_mode<synchronous>, transform_indices = @transform_4, window_bounds = array<i64: 8, 128>}]} {
    %cst = arith.constant 0.000000e+00 : f32
    %0 = vector.broadcast %cst : f32 to vector<8x8x512xf32>
    %c0 = arith.constant 0 : index
    %c0_0 = arith.constant 0 : index
    %c0_1 = arith.constant 0 : index
    %1 = vector.load %arg7[%c0, %c0_0, %c0_1] : memref<8x8x512xf32, #tpu.memory_space<vmem>>, vector<8x8x512xf32>
    tpu.vector_store %arg7[%c0, %c0_0, %c0_1], %0 {strides = array<i32>} : memref<8x8x512xf32, #tpu.memory_space<vmem>>, vector<8x8x512xf32>,
    %c0_2 = arith.constant 0 : index
    %c0_3 = arith.constant 0 : index
    %2 = memref.load %arg1[%c0_2, %c0_3] : memref<2x8xi32, #tpu.memory_space<smem>>
    %3 = arith.index_cast %2 : i32 to index
    %c0_4 = arith.constant 0 : index
    %4 = vector.load %arg2[%3, %c0_4] : memref<56x512xf32, #tpu.memory_space<vmem>>, vector<1x512xf32>
    %c0_5 = arith.constant 0 : index
    %c0_6 = arith.constant 0 : index
    %c0_7 = arith.constant 0 : index
    %5 = vector.load %arg7[%c0_5, %c0_6, %c0_7] : memref<8x8x512xf32, #tpu.memory_space<vmem>>, vector<1x1x512xf32>
    %6 = vector.shape_cast %5 : vector<1x1x512xf32> to vector<1x512xf32>
    %7 = vector.shape_cast %4 : vector<1x512xf32> to vector<1x1x512xf32>
    tpu.vector_store %arg7[%c0_5, %c0_6, %c0_7], %7 {strides = array<i32>} : memref<8x8x512xf32, #tpu.memory_space<vmem>>, vector<1x1x512xf32>,
    %c0_8 = arith.constant 0 : index
    %c1 = arith.constant 1 : index
    %8 = memref.load %arg1[%c0_8, %c1] : memref<2x8xi32, #tpu.memory_space<smem>>
    %9 = arith.index_cast %8 : i32 to index
    %c0_9 = arith.constant 0 : index
    %10 = vector.load %arg2[%9, %c0_9] : memref<56x512xf32, #tpu.memory_space<vmem>>, vector<1x512xf32>
    %c1_10 = arith.constant 1 : index
    %c0_11 = arith.constant 0 : index
    %c0_12 = arith.constant 0 : index
    %11 = vector.load %arg7[%c1_10, %c0_11, %c0_12] : memref<8x8x512xf32, #tpu.memory_space<vmem>>, vector<1x1x512xf32>
    %12 = vector.shape_cast %11 : vector<1x1x512xf32> to vector<1x512xf32>
    %13 = vector.shape_cast %10 : vector<1x512xf32> to vector<1x1x512xf32>
    tpu.vector_store %arg7[%c1_10, %c0_11, %c0_12], %13 {strides = array<i32>} : memref<8x8x512xf32, #tpu.memory_space<vmem>>, vector<1x1x512xf32>,
    %c0_13 = arith.constant 0 : index
    %c2 = arith.constant 2 : index
    %14 = memref.load %arg1[%c0_13, %c2] : memref<2x8xi32, #tpu.memory_space<smem>>
    %15 = arith.index_cast %14 : i32 to index
    %c0_14 = arith.constant 0 : index
    %16 = vector.load %arg2[%15, %c0_14] : memref<56x512xf32, #tpu.memory_space<vmem>>, vector<1x512xf32>
    %c2_15 = arith.constant 2 : index
    %c0_16 = arith.constant 0 : index
    %c0_17 = arith.constant 0 : index
    %17 = vector.load %arg7[%c2_15, %c0_16, %c0_17] : memref<8x8x512xf32, #tpu.memory_space<vmem>>, vector<1x1x512xf32>
    %18 = vector.shape_cast %17 : vector<1x1x512xf32> to vector<1x512xf32>
    %19 = vector.shape_cast %16 : vector<1x512xf32> to vector<1x1x512xf32>
    tpu.vector_store %arg7[%c2_15, %c0_16, %c0_17], %19 {strides = array<i32>} : memref<8x8x512xf32, #tpu.memory_space<vmem>>, vector<1x1x512xf32>,
    %c0_18 = arith.constant 0 : index
    %c3 = arith.constant 3 : index
    %20 = memref.load %arg1[%c0_18, %c3] : memref<2x8xi32, #tpu.memory_space<smem>>
    %21 = arith.index_cast %20 : i32 to index
    %c0_19 = arith.constant 0 : index
    %22 = vector.load %arg2[%21, %c0_19] : memref<56x512xf32, #tpu.memory_space<vmem>>, vector<1x512xf32>
    %c3_20 = arith.constant 3 : index
    %c0_21 = arith.constant 0 : index
    %c0_22 = arith.constant 0 : index
    %23 = vector.load %arg7[%c3_20, %c0_21, %c0_22] : memref<8x8x512xf32, #tpu.memory_space<vmem>>, vector<1x1x512xf32>
    %24 = vector.shape_cast %23 : vector<1x1x512xf32> to vector<1x512xf32>
    %25 = vector.shape_cast %22 : vector<1x512xf32> to vector<1x1x512xf32>
    tpu.vector_store %arg7[%c3_20, %c0_21, %c0_22], %25 {strides = array<i32>} : memref<8x8x512xf32, #tpu.memory_space<vmem>>, vector<1x1x512xf32>,
    %c0_23 = arith.constant 0 : index
    %c4 = arith.constant 4 : index
    %26 = memref.load %arg1[%c0_23, %c4] : memref<2x8xi32, #tpu.memory_space<smem>>
    %27 = arith.index_cast %26 : i32 to index
    %c0_24 = arith.constant 0 : index
    %28 = vector.load %arg2[%27, %c0_24] : memref<56x512xf32, #tpu.memory_space<vmem>>, vector<1x512xf32>
    %c4_25 = arith.constant 4 : index
    %c0_26 = arith.constant 0 : index
    %c0_27 = arith.constant 0 : index
    %29 = vector.load %arg7[%c4_25, %c0_26, %c0_27] : memref<8x8x512xf32, #tpu.memory_space<vmem>>, vector<1x1x512xf32>
    %30 = vector.shape_cast %29 : vector<1x1x512xf32> to vector<1x512xf32>
    %31 = vector.shape_cast %28 : vector<1x512xf32> to vector<1x1x512xf32>
    tpu.vector_store %arg7[%c4_25, %c0_26, %c0_27], %31 {strides = array<i32>} : memref<8x8x512xf32, #tpu.memory_space<vmem>>, vector<1x1x512xf32>,
    %c0_28 = arith.constant 0 : index
    %c5 = arith.constant 5 : index
    %32 = memref.load %arg1[%c0_28, %c5] : memref<2x8xi32, #tpu.memory_space<smem>>
    %33 = arith.index_cast %32 : i32 to index
    %c0_29 = arith.constant 0 : index
    %34 = vector.load %arg2[%33, %c0_29] : memref<56x512xf32, #tpu.memory_space<vmem>>, vector<1x512xf32>
    %c5_30 = arith.constant 5 : index
    %c0_31 = arith.constant 0 : index
    %c0_32 = arith.constant 0 : index
    %35 = vector.load %arg7[%c5_30, %c0_31, %c0_32] : memref<8x8x512xf32, #tpu.memory_space<vmem>>, vector<1x1x512xf32>
    %36 = vector.shape_cast %35 : vector<1x1x512xf32> to vector<1x512xf32>
    %37 = vector.shape_cast %34 : vector<1x512xf32> to vector<1x1x512xf32>
    tpu.vector_store %arg7[%c5_30, %c0_31, %c0_32], %37 {strides = array<i32>} : memref<8x8x512xf32, #tpu.memory_space<vmem>>, vector<1x1x512xf32>,
    %c0_33 = arith.constant 0 : index
    %c6 = arith.constant 6 : index
    %38 = memref.load %arg1[%c0_33, %c6] : memref<2x8xi32, #tpu.memory_space<smem>>
    %39 = arith.index_cast %38 : i32 to index
    %c0_34 = arith.constant 0 : index
    %40 = vector.load %arg2[%39, %c0_34] : memref<56x512xf32, #tpu.memory_space<vmem>>, vector<1x512xf32>
    %c6_35 = arith.constant 6 : index
    %c0_36 = arith.constant 0 : index
    %c0_37 = arith.constant 0 : index
    %41 = vector.load %arg7[%c6_35, %c0_36, %c0_37] : memref<8x8x512xf32, #tpu.memory_space<vmem>>, vector<1x1x512xf32>
    %42 = vector.shape_cast %41 : vector<1x1x512xf32> to vector<1x512xf32>
    %43 = vector.shape_cast %40 : vector<1x512xf32> to vector<1x1x512xf32>
    tpu.vector_store %arg7[%c6_35, %c0_36, %c0_37], %43 {strides = array<i32>} : memref<8x8x512xf32, #tpu.memory_space<vmem>>, vector<1x1x512xf32>,
    %c0_38 = arith.constant 0 : index
    %c7 = arith.constant 7 : index
    %44 = memref.load %arg1[%c0_38, %c7] : memref<2x8xi32, #tpu.memory_space<smem>>
    %45 = arith.index_cast %44 : i32 to index
    %c0_39 = arith.constant 0 : index
    %46 = vector.load %arg2[%45, %c0_39] : memref<56x512xf32, #tpu.memory_space<vmem>>, vector<1x512xf32>
    %c7_40 = arith.constant 7 : index
    %c0_41 = arith.constant 0 : index
    %c0_42 = arith.constant 0 : index
    %47 = vector.load %arg7[%c7_40, %c0_41, %c0_42] : memref<8x8x512xf32, #tpu.memory_space<vmem>>, vector<1x1x512xf32>
    %48 = vector.shape_cast %47 : vector<1x1x512xf32> to vector<1x512xf32>
    %49 = vector.shape_cast %46 : vector<1x512xf32> to vector<1x1x512xf32>
    tpu.vector_store %arg7[%c7_40, %c0_41, %c0_42], %49 {strides = array<i32>} : memref<8x8x512xf32, #tpu.memory_space<vmem>>, vector<1x1x512xf32>,
    %c1_43 = arith.constant 1 : index
    %c0_44 = arith.constant 0 : index
    %50 = memref.load %arg1[%c1_43, %c0_44] : memref<2x8xi32, #tpu.memory_space<smem>>
    %51 = arith.index_cast %50 : i32 to index
    %c0_45 = arith.constant 0 : index
    %52 = vector.load %arg2[%51, %c0_45] : memref<56x512xf32, #tpu.memory_space<vmem>>, vector<1x512xf32>
    %c0_46 = arith.constant 0 : index
    %c1_47 = arith.constant 1 : index
    %c0_48 = arith.constant 0 : index
    %53 = vector.load %arg7[%c0_46, %c1_47, %c0_48] : memref<8x8x512xf32, #tpu.memory_space<vmem>>, vector<1x1x512xf32>
    %54 = vector.shape_cast %53 : vector<1x1x512xf32> to vector<1x512xf32>
    %55 = vector.shape_cast %52 : vector<1x512xf32> to vector<1x1x512xf32>
    tpu.vector_store %arg7[%c0_46, %c1_47, %c0_48], %55 {strides = array<i32>} : memref<8x8x512xf32, #tpu.memory_space<vmem>>, vector<1x1x512xf32>,
    %c1_49 = arith.constant 1 : index
    %c1_50 = arith.constant 1 : index
    %56 = memref.load %arg1[%c1_49, %c1_50] : memref<2x8xi32, #tpu.memory_space<smem>>
    %57 = arith.index_cast %56 : i32 to index
    %c0_51 = arith.constant 0 : index
    %58 = vector.load %arg2[%57, %c0_51] : memref<56x512xf32, #tpu.memory_space<vmem>>, vector<1x512xf32>
    %c1_52 = arith.constant 1 : index
    %c1_53 = arith.constant 1 : index
    %c0_54 = arith.constant 0 : index
    %59 = vector.load %arg7[%c1_52, %c1_53, %c0_54] : memref<8x8x512xf32, #tpu.memory_space<vmem>>, vector<1x1x512xf32>
    %60 = vector.shape_cast %59 : vector<1x1x512xf32> to vector<1x512xf32>
    %61 = vector.shape_cast %58 : vector<1x512xf32> to vector<1x1x512xf32>
    tpu.vector_store %arg7[%c1_52, %c1_53, %c0_54], %61 {strides = array<i32>} : memref<8x8x512xf32, #tpu.memory_space<vmem>>, vector<1x1x512xf32>,
    %c1_55 = arith.constant 1 : index
    %c2_56 = arith.constant 2 : index
    %62 = memref.load %arg1[%c1_55, %c2_56] : memref<2x8xi32, #tpu.memory_space<smem>>
    %63 = arith.index_cast %62 : i32 to index
    %c0_57 = arith.constant 0 : index
    %64 = vector.load %arg2[%63, %c0_57] : memref<56x512xf32, #tpu.memory_space<vmem>>, vector<1x512xf32>
    %c2_58 = arith.constant 2 : index
    %c1_59 = arith.constant 1 : index
    %c0_60 = arith.constant 0 : index
    %65 = vector.load %arg7[%c2_58, %c1_59, %c0_60] : memref<8x8x512xf32, #tpu.memory_space<vmem>>, vector<1x1x512xf32>
    %66 = vector.shape_cast %65 : vector<1x1x512xf32> to vector<1x512xf32>
    %67 = vector.shape_cast %64 : vector<1x512xf32> to vector<1x1x512xf32>
    tpu.vector_store %arg7[%c2_58, %c1_59, %c0_60], %67 {strides = array<i32>} : memref<8x8x512xf32, #tpu.memory_space<vmem>>, vector<1x1x512xf32>,
    %c1_61 = arith.constant 1 : index
    %c3_62 = arith.constant 3 : index
    %68 = memref.load %arg1[%c1_61, %c3_62] : memref<2x8xi32, #tpu.memory_space<smem>>
    %69 = arith.index_cast %68 : i32 to index
    %c0_63 = arith.constant 0 : index
    %70 = vector.load %arg2[%69, %c0_63] : memref<56x512xf32, #tpu.memory_space<vmem>>, vector<1x512xf32>
    %c3_64 = arith.constant 3 : index
    %c1_65 = arith.constant 1 : index
    %c0_66 = arith.constant 0 : index
    %71 = vector.load %arg7[%c3_64, %c1_65, %c0_66] : memref<8x8x512xf32, #tpu.memory_space<vmem>>, vector<1x1x512xf32>
    %72 = vector.shape_cast %71 : vector<1x1x512xf32> to vector<1x512xf32>
    %73 = vector.shape_cast %70 : vector<1x512xf32> to vector<1x1x512xf32>
    tpu.vector_store %arg7[%c3_64, %c1_65, %c0_66], %73 {strides = array<i32>} : memref<8x8x512xf32, #tpu.memory_space<vmem>>, vector<1x1x512xf32>,
    %c1_67 = arith.constant 1 : index
    %c4_68 = arith.constant 4 : index
    %74 = memref.load %arg1[%c1_67, %c4_68] : memref<2x8xi32, #tpu.memory_space<smem>>
    %75 = arith.index_cast %74 : i32 to index
    %c0_69 = arith.constant 0 : index
    %76 = vector.load %arg2[%75, %c0_69] : memref<56x512xf32, #tpu.memory_space<vmem>>, vector<1x512xf32>
    %c4_70 = arith.constant 4 : index
    %c1_71 = arith.constant 1 : index
    %c0_72 = arith.constant 0 : index
    %77 = vector.load %arg7[%c4_70, %c1_71, %c0_72] : memref<8x8x512xf32, #tpu.memory_space<vmem>>, vector<1x1x512xf32>
    %78 = vector.shape_cast %77 : vector<1x1x512xf32> to vector<1x512xf32>
    %79 = vector.shape_cast %76 : vector<1x512xf32> to vector<1x1x512xf32>
    tpu.vector_store %arg7[%c4_70, %c1_71, %c0_72], %79 {strides = array<i32>} : memref<8x8x512xf32, #tpu.memory_space<vmem>>, vector<1x1x512xf32>,
    %c1_73 = arith.constant 1 : index
    %c5_74 = arith.constant 5 : index
    %80 = memref.load %arg1[%c1_73, %c5_74] : memref<2x8xi32, #tpu.memory_space<smem>>
    %81 = arith.index_cast %80 : i32 to index
    %c0_75 = arith.constant 0 : index
    %82 = vector.load %arg2[%81, %c0_75] : memref<56x512xf32, #tpu.memory_space<vmem>>, vector<1x512xf32>
    %c5_76 = arith.constant 5 : index
    %c1_77 = arith.constant 1 : index
    %c0_78 = arith.constant 0 : index
    %83 = vector.load %arg7[%c5_76, %c1_77, %c0_78] : memref<8x8x512xf32, #tpu.memory_space<vmem>>, vector<1x1x512xf32>
    %84 = vector.shape_cast %83 : vector<1x1x512xf32> to vector<1x512xf32>
    %85 = vector.shape_cast %82 : vector<1x512xf32> to vector<1x1x512xf32>
    tpu.vector_store %arg7[%c5_76, %c1_77, %c0_78], %85 {strides = array<i32>} : memref<8x8x512xf32, #tpu.memory_space<vmem>>, vector<1x1x512xf32>,
    %c1_79 = arith.constant 1 : index
    %c6_80 = arith.constant 6 : index
    %86 = memref.load %arg1[%c1_79, %c6_80] : memref<2x8xi32, #tpu.memory_space<smem>>
    %87 = arith.index_cast %86 : i32 to index
    %c0_81 = arith.constant 0 : index
    %88 = vector.load %arg2[%87, %c0_81] : memref<56x512xf32, #tpu.memory_space<vmem>>, vector<1x512xf32>
    %c6_82 = arith.constant 6 : index
    %c1_83 = arith.constant 1 : index
    %c0_84 = arith.constant 0 : index
    %89 = vector.load %arg7[%c6_82, %c1_83, %c0_84] : memref<8x8x512xf32, #tpu.memory_space<vmem>>, vector<1x1x512xf32>
    %90 = vector.shape_cast %89 : vector<1x1x512xf32> to vector<1x512xf32>
    %91 = vector.shape_cast %88 : vector<1x512xf32> to vector<1x1x512xf32>
    tpu.vector_store %arg7[%c6_82, %c1_83, %c0_84], %91 {strides = array<i32>} : memref<8x8x512xf32, #tpu.memory_space<vmem>>, vector<1x1x512xf32>,
    %c1_85 = arith.constant 1 : index
    %c7_86 = arith.constant 7 : index
    %92 = memref.load %arg1[%c1_85, %c7_86] : memref<2x8xi32, #tpu.memory_space<smem>>
    %93 = arith.index_cast %92 : i32 to index
    %c0_87 = arith.constant 0 : index
    %94 = vector.load %arg2[%93, %c0_87] : memref<56x512xf32, #tpu.memory_space<vmem>>, vector<1x512xf32>
    %c7_88 = arith.constant 7 : index
    %c1_89 = arith.constant 1 : index
    %c0_90 = arith.constant 0 : index
    %95 = vector.load %arg7[%c7_88, %c1_89, %c0_90] : memref<8x8x512xf32, #tpu.memory_space<vmem>>, vector<1x1x512xf32>
    %96 = vector.shape_cast %95 : vector<1x1x512xf32> to vector<1x512xf32>
    %97 = vector.shape_cast %94 : vector<1x512xf32> to vector<1x1x512xf32>
    tpu.vector_store %arg7[%c7_88, %c1_89, %c0_90], %97 {strides = array<i32>} : memref<8x8x512xf32, #tpu.memory_space<vmem>>, vector<1x1x512xf32>,
    %c0_91 = arith.constant 0 : index
    %c0_92 = arith.constant 0 : index
    %98 = vector.load %arg3[%c0_91, %c0_92] : memref<128x512xf32, #tpu.memory_space<vmem>>, vector<128x512xf32>
    %cst_93 = arith.constant 0.000000e+00 : f32
    %99 = vector.broadcast %cst_93 : f32 to vector<8x128xf32>
    %cst_94 = arith.constant 0.000000e+00 : f32
    %100 = vector.broadcast %cst_94 : f32 to vector<8x128xf32>
    %c0_i32 = arith.constant 0 : i32
    %101 = arith.index_cast %c0_i32 : i32 to index
    %c0_95 = arith.constant 0 : index
    %c0_96 = arith.constant 0 : index
    %102 = vector.load %arg7[%101, %c0_95, %c0_96] : memref<8x8x512xf32, #tpu.memory_space<vmem>>, vector<1x8x512xf32>
    %103 = vector.shape_cast %102 : vector<1x8x512xf32> to vector<8x512xf32>
    %cst_97 = arith.constant dense<0.000000e+00> : vector<8x512xf32>
    %104 = tpu.matmul %99, %98, %cst_97 {dimension_numbers = #tpu.dot_dimension_numbers<[1], [0], [0], [1], [0, 0, 1, 1], [], []>} : vector<8x128xf32>, vector<128x512xf32>, vector<8x512xf32> -> vector<8x512xf32>
    %105 = arith.addf %103, %104 : vector<8x512xf32>
    %106 = vector.extract_strided_slice %105 {offsets = [0, 0], sizes = [8, 128], strides = [1, 1]} : vector<8x512xf32> to vector<8x128xf32>
    %107 = arith.negf %106 : vector<8x128xf32>
    %108 = math.exp %107 : vector<8x128xf32>
    %cst_98 = arith.constant 1.000000e+00 : f32
    %109 = vector.broadcast %cst_98 : f32 to vector<8x128xf32>
    %110 = arith.addf %109, %108 : vector<8x128xf32>
    %111 = arith.divf %109, %110 : vector<8x128xf32>
    %112 = vector.extract_strided_slice %105 {offsets = [0, 128], sizes = [8, 128], strides = [1, 1]} : vector<8x512xf32> to vector<8x128xf32>
    %113 = arith.negf %112 : vector<8x128xf32>
    %114 = math.exp %113 : vector<8x128xf32>
    %cst_99 = arith.constant 1.000000e+00 : f32
    %115 = vector.broadcast %cst_99 : f32 to vector<8x128xf32>
    %116 = arith.addf %115, %114 : vector<8x128xf32>
    %117 = arith.divf %115, %116 : vector<8x128xf32>
    %118 = vector.extract_strided_slice %105 {offsets = [0, 256], sizes = [8, 128], strides = [1, 1]} : vector<8x512xf32> to vector<8x128xf32>
    %119 = math.tanh %118 : vector<8x128xf32>
    %120 = vector.extract_strided_slice %105 {offsets = [0, 384], sizes = [8, 128], strides = [1, 1]} : vector<8x512xf32> to vector<8x128xf32>
    %121 = arith.negf %120 : vector<8x128xf32>
    %122 = math.exp %121 : vector<8x128xf32>
    %cst_100 = arith.constant 1.000000e+00 : f32
    %123 = vector.broadcast %cst_100 : f32 to vector<8x128xf32>
    %124 = arith.addf %123, %122 : vector<8x128xf32>
    %125 = arith.divf %123, %124 : vector<8x128xf32>
    %126 = arith.mulf %117, %100 : vector<8x128xf32>
    %127 = arith.mulf %111, %119 : vector<8x128xf32>
    %128 = arith.addf %126, %127 : vector<8x128xf32>
    %129 = math.tanh %128 : vector<8x128xf32>
    %130 = arith.mulf %125, %129 : vector<8x128xf32>
    %c1_i32 = arith.constant 1 : i32
    %131 = arith.index_cast %c1_i32 : i32 to index
    %c0_101 = arith.constant 0 : index
    %c0_102 = arith.constant 0 : index
    %132 = vector.load %arg7[%131, %c0_101, %c0_102] : memref<8x8x512xf32, #tpu.memory_space<vmem>>, vector<1x8x512xf32>
    %133 = vector.shape_cast %132 : vector<1x8x512xf32> to vector<8x512xf32>
    %cst_103 = arith.constant dense<0.000000e+00> : vector<8x512xf32>
    %134 = tpu.matmul %130, %98, %cst_103 {dimension_numbers = #tpu.dot_dimension_numbers<[1], [0], [0], [1], [0, 0, 1, 1], [], []>} : vector<8x128xf32>, vector<128x512xf32>, vector<8x512xf32> -> vector<8x512xf32>
    %135 = arith.addf %133, %134 : vector<8x512xf32>
    %136 = vector.extract_strided_slice %135 {offsets = [0, 0], sizes = [8, 128], strides = [1, 1]} : vector<8x512xf32> to vector<8x128xf32>
    %137 = arith.negf %136 : vector<8x128xf32>
    %138 = math.exp %137 : vector<8x128xf32>
    %cst_104 = arith.constant 1.000000e+00 : f32
    %139 = vector.broadcast %cst_104 : f32 to vector<8x128xf32>
    %140 = arith.addf %139, %138 : vector<8x128xf32>
    %141 = arith.divf %139, %140 : vector<8x128xf32>
    %142 = vector.extract_strided_slice %135 {offsets = [0, 128], sizes = [8, 128], strides = [1, 1]} : vector<8x512xf32> to vector<8x128xf32>
    %143 = arith.negf %142 : vector<8x128xf32>
    %144 = math.exp %143 : vector<8x128xf32>
    %cst_105 = arith.constant 1.000000e+00 : f32
    %145 = vector.broadcast %cst_105 : f32 to vector<8x128xf32>
    %146 = arith.addf %145, %144 : vector<8x128xf32>
    %147 = arith.divf %145, %146 : vector<8x128xf32>
    %148 = vector.extract_strided_slice %135 {offsets = [0, 256], sizes = [8, 128], strides = [1, 1]} : vector<8x512xf32> to vector<8x128xf32>
    %149 = math.tanh %148 : vector<8x128xf32>
    %150 = vector.extract_strided_slice %135 {offsets = [0, 384], sizes = [8, 128], strides = [1, 1]} : vector<8x512xf32> to vector<8x128xf32>
    %151 = arith.negf %150 : vector<8x128xf32>
    %152 = math.exp %151 : vector<8x128xf32>
    %cst_106 = arith.constant 1.000000e+00 : f32
    %153 = vector.broadcast %cst_106 : f32 to vector<8x128xf32>
    %154 = arith.addf %153, %152 : vector<8x128xf32>
    %155 = arith.divf %153, %154 : vector<8x128xf32>
    %156 = arith.mulf %147, %128 : vector<8x128xf32>
    %157 = arith.mulf %141, %149 : vector<8x128xf32>
    %158 = arith.addf %156, %157 : vector<8x128xf32>
    %159 = math.tanh %158 : vector<8x128xf32>
    %160 = arith.mulf %155, %159 : vector<8x128xf32>
    %c2_i32 = arith.constant 2 : i32
    %161 = arith.index_cast %c2_i32 : i32 to index
    %c0_107 = arith.constant 0 : index
    %c0_108 = arith.constant 0 : index
    %162 = vector.load %arg7[%161, %c0_107, %c0_108] : memref<8x8x512xf32, #tpu.memory_space<vmem>>, vector<1x8x512xf32>
    %163 = vector.shape_cast %162 : vector<1x8x512xf32> to vector<8x512xf32>
    %cst_109 = arith.constant dense<0.000000e+00> : vector<8x512xf32>
    %164 = tpu.matmul %160, %98, %cst_109 {dimension_numbers = #tpu.dot_dimension_numbers<[1], [0], [0], [1], [0, 0, 1, 1], [], []>} : vector<8x128xf32>, vector<128x512xf32>, vector<8x512xf32> -> vector<8x512xf32>
    %165 = arith.addf %163, %164 : vector<8x512xf32>
    %166 = vector.extract_strided_slice %165 {offsets = [0, 0], sizes = [8, 128], strides = [1, 1]} : vector<8x512xf32> to vector<8x128xf32>
    %167 = arith.negf %166 : vector<8x128xf32>
    %168 = math.exp %167 : vector<8x128xf32>
    %cst_110 = arith.constant 1.000000e+00 : f32
    %169 = vector.broadcast %cst_110 : f32 to vector<8x128xf32>
    %170 = arith.addf %169, %168 : vector<8x128xf32>
    %171 = arith.divf %169, %170 : vector<8x128xf32>
    %172 = vector.extract_strided_slice %165 {offsets = [0, 128], sizes = [8, 128], strides = [1, 1]} : vector<8x512xf32> to vector<8x128xf32>
    %173 = arith.negf %172 : vector<8x128xf32>
    %174 = math.exp %173 : vector<8x128xf32>
    %cst_111 = arith.constant 1.000000e+00 : f32
    %175 = vector.broadcast %cst_111 : f32 to vector<8x128xf32>
    %176 = arith.addf %175, %174 : vector<8x128xf32>
    %177 = arith.divf %175, %176 : vector<8x128xf32>
    %178 = vector.extract_strided_slice %165 {offsets = [0, 256], sizes = [8, 128], strides = [1, 1]} : vector<8x512xf32> to vector<8x128xf32>
    %179 = math.tanh %178 : vector<8x128xf32>
    %180 = vector.extract_strided_slice %165 {offsets = [0, 384], sizes = [8, 128], strides = [1, 1]} : vector<8x512xf32> to vector<8x128xf32>
    %181 = arith.negf %180 : vector<8x128xf32>
    %182 = math.exp %181 : vector<8x128xf32>
    %cst_112 = arith.constant 1.000000e+00 : f32
    %183 = vector.broadcast %cst_112 : f32 to vector<8x128xf32>
    %184 = arith.addf %183, %182 : vector<8x128xf32>
    %185 = arith.divf %183, %184 : vector<8x128xf32>
    %186 = arith.mulf %177, %158 : vector<8x128xf32>
    %187 = arith.mulf %171, %179 : vector<8x128xf32>
    %188 = arith.addf %186, %187 : vector<8x128xf32>
    %189 = math.tanh %188 : vector<8x128xf32>
    %190 = arith.mulf %185, %189 : vector<8x128xf32>
    %c3_i32 = arith.constant 3 : i32
    %191 = arith.index_cast %c3_i32 : i32 to index
    %c0_113 = arith.constant 0 : index
    %c0_114 = arith.constant 0 : index
    %192 = vector.load %arg7[%191, %c0_113, %c0_114] : memref<8x8x512xf32, #tpu.memory_space<vmem>>, vector<1x8x512xf32>
    %193 = vector.shape_cast %192 : vector<1x8x512xf32> to vector<8x512xf32>
    %cst_115 = arith.constant dense<0.000000e+00> : vector<8x512xf32>
    %194 = tpu.matmul %190, %98, %cst_115 {dimension_numbers = #tpu.dot_dimension_numbers<[1], [0], [0], [1], [0, 0, 1, 1], [], []>} : vector<8x128xf32>, vector<128x512xf32>, vector<8x512xf32> -> vector<8x512xf32>
    %195 = arith.addf %193, %194 : vector<8x512xf32>
    %196 = vector.extract_strided_slice %195 {offsets = [0, 0], sizes = [8, 128], strides = [1, 1]} : vector<8x512xf32> to vector<8x128xf32>
    %197 = arith.negf %196 : vector<8x128xf32>
    %198 = math.exp %197 : vector<8x128xf32>
    %cst_116 = arith.constant 1.000000e+00 : f32
    %199 = vector.broadcast %cst_116 : f32 to vector<8x128xf32>
    %200 = arith.addf %199, %198 : vector<8x128xf32>
    %201 = arith.divf %199, %200 : vector<8x128xf32>
    %202 = vector.extract_strided_slice %195 {offsets = [0, 128], sizes = [8, 128], strides = [1, 1]} : vector<8x512xf32> to vector<8x128xf32>
    %203 = arith.negf %202 : vector<8x128xf32>
    %204 = math.exp %203 : vector<8x128xf32>
    %cst_117 = arith.constant 1.000000e+00 : f32
    %205 = vector.broadcast %cst_117 : f32 to vector<8x128xf32>
    %206 = arith.addf %205, %204 : vector<8x128xf32>
    %207 = arith.divf %205, %206 : vector<8x128xf32>
    %208 = vector.extract_strided_slice %195 {offsets = [0, 256], sizes = [8, 128], strides = [1, 1]} : vector<8x512xf32> to vector<8x128xf32>
    %209 = math.tanh %208 : vector<8x128xf32>
    %210 = vector.extract_strided_slice %195 {offsets = [0, 384], sizes = [8, 128], strides = [1, 1]} : vector<8x512xf32> to vector<8x128xf32>
    %211 = arith.negf %210 : vector<8x128xf32>
    %212 = math.exp %211 : vector<8x128xf32>
    %cst_118 = arith.constant 1.000000e+00 : f32
    %213 = vector.broadcast %cst_118 : f32 to vector<8x128xf32>
    %214 = arith.addf %213, %212 : vector<8x128xf32>
    %215 = arith.divf %213, %214 : vector<8x128xf32>
    %216 = arith.mulf %207, %188 : vector<8x128xf32>
    %217 = arith.mulf %201, %209 : vector<8x128xf32>
    %218 = arith.addf %216, %217 : vector<8x128xf32>
    %219 = math.tanh %218 : vector<8x128xf32>
    %220 = arith.mulf %215, %219 : vector<8x128xf32>
    %c4_i32 = arith.constant 4 : i32
    %221 = arith.index_cast %c4_i32 : i32 to index
    %c0_119 = arith.constant 0 : index
    %c0_120 = arith.constant 0 : index
    %222 = vector.load %arg7[%221, %c0_119, %c0_120] : memref<8x8x512xf32, #tpu.memory_space<vmem>>, vector<1x8x512xf32>
    %223 = vector.shape_cast %222 : vector<1x8x512xf32> to vector<8x512xf32>
    %cst_121 = arith.constant dense<0.000000e+00> : vector<8x512xf32>
    %224 = tpu.matmul %220, %98, %cst_121 {dimension_numbers = #tpu.dot_dimension_numbers<[1], [0], [0], [1], [0, 0, 1, 1], [], []>} : vector<8x128xf32>, vector<128x512xf32>, vector<8x512xf32> -> vector<8x512xf32>
    %225 = arith.addf %223, %224 : vector<8x512xf32>
    %226 = vector.extract_strided_slice %225 {offsets = [0, 0], sizes = [8, 128], strides = [1, 1]} : vector<8x512xf32> to vector<8x128xf32>
    %227 = arith.negf %226 : vector<8x128xf32>
    %228 = math.exp %227 : vector<8x128xf32>
    %cst_122 = arith.constant 1.000000e+00 : f32
    %229 = vector.broadcast %cst_122 : f32 to vector<8x128xf32>
    %230 = arith.addf %229, %228 : vector<8x128xf32>
    %231 = arith.divf %229, %230 : vector<8x128xf32>
    %232 = vector.extract_strided_slice %225 {offsets = [0, 128], sizes = [8, 128], strides = [1, 1]} : vector<8x512xf32> to vector<8x128xf32>
    %233 = arith.negf %232 : vector<8x128xf32>
    %234 = math.exp %233 : vector<8x128xf32>
    %cst_123 = arith.constant 1.000000e+00 : f32
    %235 = vector.broadcast %cst_123 : f32 to vector<8x128xf32>
    %236 = arith.addf %235, %234 : vector<8x128xf32>
    %237 = arith.divf %235, %236 : vector<8x128xf32>
    %238 = vector.extract_strided_slice %225 {offsets = [0, 256], sizes = [8, 128], strides = [1, 1]} : vector<8x512xf32> to vector<8x128xf32>
    %239 = math.tanh %238 : vector<8x128xf32>
    %240 = vector.extract_strided_slice %225 {offsets = [0, 384], sizes = [8, 128], strides = [1, 1]} : vector<8x512xf32> to vector<8x128xf32>
    %241 = arith.negf %240 : vector<8x128xf32>
    %242 = math.exp %241 : vector<8x128xf32>
    %cst_124 = arith.constant 1.000000e+00 : f32
    %243 = vector.broadcast %cst_124 : f32 to vector<8x128xf32>
    %244 = arith.addf %243, %242 : vector<8x128xf32>
    %245 = arith.divf %243, %244 : vector<8x128xf32>
    %246 = arith.mulf %237, %218 : vector<8x128xf32>
    %247 = arith.mulf %231, %239 : vector<8x128xf32>
    %248 = arith.addf %246, %247 : vector<8x128xf32>
    %249 = math.tanh %248 : vector<8x128xf32>
    %250 = arith.mulf %245, %249 : vector<8x128xf32>
    %c5_i32 = arith.constant 5 : i32
    %251 = arith.index_cast %c5_i32 : i32 to index
    %c0_125 = arith.constant 0 : index
    %c0_126 = arith.constant 0 : index
    %252 = vector.load %arg7[%251, %c0_125, %c0_126] : memref<8x8x512xf32, #tpu.memory_space<vmem>>, vector<1x8x512xf32>
    %253 = vector.shape_cast %252 : vector<1x8x512xf32> to vector<8x512xf32>
    %cst_127 = arith.constant dense<0.000000e+00> : vector<8x512xf32>
    %254 = tpu.matmul %250, %98, %cst_127 {dimension_numbers = #tpu.dot_dimension_numbers<[1], [0], [0], [1], [0, 0, 1, 1], [], []>} : vector<8x128xf32>, vector<128x512xf32>, vector<8x512xf32> -> vector<8x512xf32>
    %255 = arith.addf %253, %254 : vector<8x512xf32>
    %256 = vector.extract_strided_slice %255 {offsets = [0, 0], sizes = [8, 128], strides = [1, 1]} : vector<8x512xf32> to vector<8x128xf32>
    %257 = arith.negf %256 : vector<8x128xf32>
    %258 = math.exp %257 : vector<8x128xf32>
    %cst_128 = arith.constant 1.000000e+00 : f32
    %259 = vector.broadcast %cst_128 : f32 to vector<8x128xf32>
    %260 = arith.addf %259, %258 : vector<8x128xf32>
    %261 = arith.divf %259, %260 : vector<8x128xf32>
    %262 = vector.extract_strided_slice %255 {offsets = [0, 128], sizes = [8, 128], strides = [1, 1]} : vector<8x512xf32> to vector<8x128xf32>
    %263 = arith.negf %262 : vector<8x128xf32>
    %264 = math.exp %263 : vector<8x128xf32>
    %cst_129 = arith.constant 1.000000e+00 : f32
    %265 = vector.broadcast %cst_129 : f32 to vector<8x128xf32>
    %266 = arith.addf %265, %264 : vector<8x128xf32>
    %267 = arith.divf %265, %266 : vector<8x128xf32>
    %268 = vector.extract_strided_slice %255 {offsets = [0, 256], sizes = [8, 128], strides = [1, 1]} : vector<8x512xf32> to vector<8x128xf32>
    %269 = math.tanh %268 : vector<8x128xf32>
    %270 = vector.extract_strided_slice %255 {offsets = [0, 384], sizes = [8, 128], strides = [1, 1]} : vector<8x512xf32> to vector<8x128xf32>
    %271 = arith.negf %270 : vector<8x128xf32>
    %272 = math.exp %271 : vector<8x128xf32>
    %cst_130 = arith.constant 1.000000e+00 : f32
    %273 = vector.broadcast %cst_130 : f32 to vector<8x128xf32>
    %274 = arith.addf %273, %272 : vector<8x128xf32>
    %275 = arith.divf %273, %274 : vector<8x128xf32>
    %276 = arith.mulf %267, %248 : vector<8x128xf32>
    %277 = arith.mulf %261, %269 : vector<8x128xf32>
    %278 = arith.addf %276, %277 : vector<8x128xf32>
    %279 = math.tanh %278 : vector<8x128xf32>
    %280 = arith.mulf %275, %279 : vector<8x128xf32>
    %c6_i32 = arith.constant 6 : i32
    %281 = arith.index_cast %c6_i32 : i32 to index
    %c0_131 = arith.constant 0 : index
    %c0_132 = arith.constant 0 : index
    %282 = vector.load %arg7[%281, %c0_131, %c0_132] : memref<8x8x512xf32, #tpu.memory_space<vmem>>, vector<1x8x512xf32>
    %283 = vector.shape_cast %282 : vector<1x8x512xf32> to vector<8x512xf32>
    %cst_133 = arith.constant dense<0.000000e+00> : vector<8x512xf32>
    %284 = tpu.matmul %280, %98, %cst_133 {dimension_numbers = #tpu.dot_dimension_numbers<[1], [0], [0], [1], [0, 0, 1, 1], [], []>} : vector<8x128xf32>, vector<128x512xf32>, vector<8x512xf32> -> vector<8x512xf32>
    %285 = arith.addf %283, %284 : vector<8x512xf32>
    %286 = vector.extract_strided_slice %285 {offsets = [0, 0], sizes = [8, 128], strides = [1, 1]} : vector<8x512xf32> to vector<8x128xf32>
    %287 = arith.negf %286 : vector<8x128xf32>
    %288 = math.exp %287 : vector<8x128xf32>
    %cst_134 = arith.constant 1.000000e+00 : f32
    %289 = vector.broadcast %cst_134 : f32 to vector<8x128xf32>
    %290 = arith.addf %289, %288 : vector<8x128xf32>
    %291 = arith.divf %289, %290 : vector<8x128xf32>
    %292 = vector.extract_strided_slice %285 {offsets = [0, 128], sizes = [8, 128], strides = [1, 1]} : vector<8x512xf32> to vector<8x128xf32>
    %293 = arith.negf %292 : vector<8x128xf32>
    %294 = math.exp %293 : vector<8x128xf32>
    %cst_135 = arith.constant 1.000000e+00 : f32
    %295 = vector.broadcast %cst_135 : f32 to vector<8x128xf32>
    %296 = arith.addf %295, %294 : vector<8x128xf32>
    %297 = arith.divf %295, %296 : vector<8x128xf32>
    %298 = vector.extract_strided_slice %285 {offsets = [0, 256], sizes = [8, 128], strides = [1, 1]} : vector<8x512xf32> to vector<8x128xf32>
    %299 = math.tanh %298 : vector<8x128xf32>
    %300 = vector.extract_strided_slice %285 {offsets = [0, 384], sizes = [8, 128], strides = [1, 1]} : vector<8x512xf32> to vector<8x128xf32>
    %301 = arith.negf %300 : vector<8x128xf32>
    %302 = math.exp %301 : vector<8x128xf32>
    %cst_136 = arith.constant 1.000000e+00 : f32
    %303 = vector.broadcast %cst_136 : f32 to vector<8x128xf32>
    %304 = arith.addf %303, %302 : vector<8x128xf32>
    %305 = arith.divf %303, %304 : vector<8x128xf32>
    %306 = arith.mulf %297, %278 : vector<8x128xf32>
    %307 = arith.mulf %291, %299 : vector<8x128xf32>
    %308 = arith.addf %306, %307 : vector<8x128xf32>
    %309 = math.tanh %308 : vector<8x128xf32>
    %310 = arith.mulf %305, %309 : vector<8x128xf32>
    %c7_i32 = arith.constant 7 : i32
    %311 = arith.index_cast %c7_i32 : i32 to index
    %c0_137 = arith.constant 0 : index
    %c0_138 = arith.constant 0 : index
    %312 = vector.load %arg7[%311, %c0_137, %c0_138] : memref<8x8x512xf32, #tpu.memory_space<vmem>>, vector<1x8x512xf32>
    %313 = vector.shape_cast %312 : vector<1x8x512xf32> to vector<8x512xf32>
    %cst_139 = arith.constant dense<0.000000e+00> : vector<8x512xf32>
    %314 = tpu.matmul %310, %98, %cst_139 {dimension_numbers = #tpu.dot_dimension_numbers<[1], [0], [0], [1], [0, 0, 1, 1], [], []>} : vector<8x128xf32>, vector<128x512xf32>, vector<8x512xf32> -> vector<8x512xf32>
    %315 = arith.addf %313, %314 : vector<8x512xf32>
    %316 = vector.extract_strided_slice %315 {offsets = [0, 0], sizes = [8, 128], strides = [1, 1]} : vector<8x512xf32> to vector<8x128xf32>
    %317 = arith.negf %316 : vector<8x128xf32>
    %318 = math.exp %317 : vector<8x128xf32>
    %cst_140 = arith.constant 1.000000e+00 : f32
    %319 = vector.broadcast %cst_140 : f32 to vector<8x128xf32>
    %320 = arith.addf %319, %318 : vector<8x128xf32>
    %321 = arith.divf %319, %320 : vector<8x128xf32>
    %322 = vector.extract_strided_slice %315 {offsets = [0, 128], sizes = [8, 128], strides = [1, 1]} : vector<8x512xf32> to vector<8x128xf32>
    %323 = arith.negf %322 : vector<8x128xf32>
    %324 = math.exp %323 : vector<8x128xf32>
    %cst_141 = arith.constant 1.000000e+00 : f32
    %325 = vector.broadcast %cst_141 : f32 to vector<8x128xf32>
    %326 = arith.addf %325, %324 : vector<8x128xf32>
    %327 = arith.divf %325, %326 : vector<8x128xf32>
    %328 = vector.extract_strided_slice %315 {offsets = [0, 256], sizes = [8, 128], strides = [1, 1]} : vector<8x512xf32> to vector<8x128xf32>
    %329 = math.tanh %328 : vector<8x128xf32>
    %330 = vector.extract_strided_slice %315 {offsets = [0, 384], sizes = [8, 128], strides = [1, 1]} : vector<8x512xf32> to vector<8x128xf32>
    %331 = arith.negf %330 : vector<8x128xf32>
    %332 = math.exp %331 : vector<8x128xf32>
    %cst_142 = arith.constant 1.000000e+00 : f32
    %333 = vector.broadcast %cst_142 : f32 to vector<8x128xf32>
    %334 = arith.addf %333, %332 : vector<8x128xf32>
    %335 = arith.divf %333, %334 : vector<8x128xf32>
    %336 = arith.mulf %327, %308 : vector<8x128xf32>
    %337 = arith.mulf %321, %329 : vector<8x128xf32>
    %338 = arith.addf %336, %337 : vector<8x128xf32>
    %339 = math.tanh %338 : vector<8x128xf32>
    %340 = arith.mulf %335, %339 : vector<8x128xf32>
    %c8_i32 = arith.constant 8 : i32
    %c0_143 = arith.constant 0 : index
    %c0_144 = arith.constant 0 : index
    %341 = vector.load %arg4[%c0_143, %c0_144] : memref<128x128xf32, #tpu.memory_space<vmem>>, vector<128x128xf32>
    %cst_145 = arith.constant dense<0.000000e+00> : vector<8x128xf32>
    %342 = tpu.matmul %340, %341, %cst_145 {dimension_numbers = #tpu.dot_dimension_numbers<[1], [0], [0], [1], [0, 0, 1, 1], [], []>} : vector<8x128xf32>, vector<128x128xf32>, vector<8x128xf32> -> vector<8x128xf32>
    %c0_146 = arith.constant 0 : index
    %c0_147 = arith.constant 0 : index
    %343 = vector.load %arg5[%c0_146, %c0_147] : memref<1x128xf32, #tpu.memory_space<vmem>>, vector<1x128xf32>
    %344 = vector.broadcast %343 : vector<1x128xf32> to vector<8x128xf32>
    %345 = arith.addf %342, %344 : vector<8x128xf32>
    %c0_148 = arith.constant 0 : index
    %c0_149 = arith.constant 0 : index
    %346 = vector.load %arg6[%c0_148, %c0_149] : memref<8x128xf32, #tpu.memory_space<vmem>>, vector<8x128xf32>
    tpu.vector_store %arg6[%c0_148, %c0_149], %345 {strides = array<i32>} : memref<8x128xf32, #tpu.memory_space<vmem>>, vector<8x128xf32>,
    return
  }
  func.func @transform_0(%arg0: i32, %arg1: memref<2x8xi32, #tpu.memory_space<smem>>) -> (i32, i32) {
    %c0_i32 = arith.constant 0 : i32
    %c0_i32_0 = arith.constant 0 : i32
    %c0_i32_1 = arith.constant 0 : i32
    return %c0_i32, %c0_i32_0 : i32, i32
  }
  func.func @transform_1(%arg0: i32, %arg1: memref<2x8xi32, #tpu.memory_space<smem>>) -> (i32, i32) {
    %c0_i32 = arith.constant 0 : i32
    %c0_i32_0 = arith.constant 0 : i32
    %c0_i32_1 = arith.constant 0 : i32
    return %c0_i32, %c0_i32_0 : i32, i32
  }
  func.func @transform_2(%arg0: i32, %arg1: memref<2x8xi32, #tpu.memory_space<smem>>) -> (i32, i32) {
    %c0_i32 = arith.constant 0 : i32
    %c0_i32_0 = arith.constant 0 : i32
    %c0_i32_1 = arith.constant 0 : i32
    return %c0_i32, %c0_i32_0 : i32, i32
  }
  func.func @transform_3(%arg0: i32, %arg1: memref<2x8xi32, #tpu.memory_space<smem>>) -> (i32, i32) {
    %c0_i32 = arith.constant 0 : i32
    %c0_i32_0 = arith.constant 0 : i32
    %c0_i32_1 = arith.constant 0 : i32
    return %c0_i32, %c0_i32_0 : i32, i32
  }
  func.func @transform_4(%arg0: i32, %arg1: memref<2x8xi32, #tpu.memory_space<smem>>) -> (i32, i32) {
    %c0_i32 = arith.constant 0 : i32
    %c0_i32_0 = arith.constant 0 : i32
    %c0_i32_1 = arith.constant 0 : i32
    return %c0_i32, %c0_i32_0 : i32, i32
  }
}

</mosaic_0001>

<bundles_post_ra>
// kernel: tpu_custom_call.1
= control target key start
LH: loop header
LB: loop body
LE: loop exit
PB: predicated region body
PF: predicated region fallthrough
CT: control target
= control target key end

     0   :  { %s3414_s0 = inlined_call_operand.hbm [shape: s32[2,8], index: 0, kind: input, shape index: {}]   ;;  %s3415_s1 = inlined_call_operand.hbm [shape: f32[56,512], index: 1, kind: input, shape index: {}]   ;;  %s3416_s2 = inlined_call_operand.hbm [shape: f32[128,512], index: 2, kind: input, shape index: {}]   ;;  %s3417_s3 = inlined_call_operand.hbm [shape: f32[128,128], index: 3, kind: input, shape index: {}]   ;;  %s3418_s4 = inlined_call_operand.vmem [shape: f32[1,128], index: 4, kind: input, shape index: {}]   ;;  %s3419_s5 = inlined_call_operand.hbm [shape: f32[8,128], index: 5, kind: output, shape index: {}]  }
   0x1   :  { %s2745_s20 = scalar_lea.hbm %s3414_s0, 32 }
   0x2   :  { %p2746_p0 = scmp.ne.s32.totalorder %s3414_s0, %s2745_s20  ;;  %p2749_p1 = scmp.lt.u32.totalorder %s2745_s20, %s3414_s0 }
   0x4   :  { %p2751_p2 = pnand %p2749_p1, %p2746_p0 }
   0x6   :  { %2754 = shalt.err (!%p2751_p2)  }
   0x7   :  { %s2851_s25 = smov [#allocation4]  }
   0x8   :  { %11 = dma.hbm_to_smem %s3414_s0, 32, %s2851_s25, [#allocation3] }
   0x9   :  { %2843 = dma.done.wait [#allocation3], 32 }
   0xa   :  { %2844 = vsyncadd [#allocation3], 4294967264 }
   0xb   :  { %13 = sfence }
   0xc   :  { %14 = vsyncpa [#allocation6], 0 }
   0xd   :  { %15 = vsyncpa [#allocation9], 0 }
   0xe   :  { %16 = vsyncpa [#allocation7], 0  ;;  %s2852_s28 = smov [#allocation8]   ;;  %s2853_s30 = smov [#allocation5]  }
   0xf   :  { %s34_s29 = sshll.u32 %s2852_s28, 4  ;;  %s22_s6 = sshll.u32 %s2853_s30, 4  ;;  %s35_s29 = int_to_ptr.vmem [resolvable:$true] %s34_s29  ;;  %s2905_s6 = int_to_ptr.vmem [resolvable:$true] %s22_s6 }
  0x10   :  { %s2755_s9 = scalar_lea.hbm %s3416_s2, 8192 }
  0x11   :  { %p2756_p3 = scmp.ne.s32.totalorder %s3416_s2, %s2755_s9  ;;  %p2759_p4 = scmp.lt.u32.totalorder %s2755_s9, %s3416_s2 }
  0x13   :  { %p2761_p5 = pnand %p2759_p4, %p2756_p3 }
  0x15   :  { %2764 = shalt.err (!%p2761_p5)
}
  0x16   :  { %s2765_s13 = scalar_lea.vmem %s35_s29, 8192  ;;  %p2770_p7 = scmp.lt.s32.totalorder %s35_s29, %s35_s29 }
  0x17   :  { %p2766_p6 = scmp.ne.s32.totalorder %s35_s29, %s2765_s13  ;;  %p2771_p8 = scmp.lt.s32.totalorder %s2765_s13, %s2765_s13 }
  0x19   :  { %p2772_p9 = por %p2771_p8, %p2770_p7 }
  0x1b   :  { %p2773_p10 = pnand %p2772_p9, %p2766_p6 }
  0x1d   :  { %2776 = shalt.err (!%p2773_p10)
}
  0x1e   :  { %s2854_s14 = smov 512   ;;  %s2855_s15 = smov 32  }
  0x1f   :  { %40 = dma.hbm_to_vmem [thread:$0]  %s3416_s2, 8192, %s35_s29, [#allocation9], %s2854_s14, %s2854_s14, %s2855_s15  }
  0x20   :  { %s2777_s20 = scalar_lea.hbm %s3415_s1, 3584 }
  0x21   :  { %p2778_p11 = scmp.ne.s32.totalorder %s3415_s1, %s2777_s20  ;;  %p2781_p12 = scmp.lt.u32.totalorder %s2777_s20, %s3415_s1 }
  0x23   :  { %p2783_p13 = pnand %p2781_p12, %p2778_p11 }
  0x25   :  { %2786 = shalt.err (!%p2783_p13)
}
  0x26   :  { %s2787_s25 = scalar_lea.vmem %s2905_s6, 3584  ;;  %p2792_p1 = scmp.lt.s32.totalorder %s2905_s6, %s2905_s6 }
  0x27   :  { %p2788_p0 = scmp.ne.s32.totalorder %s2905_s6, %s2787_s25  ;;  %p2793_p2 = scmp.lt.s32.totalorder %s2787_s25, %s2787_s25 }
  0x29   :  { %p2794_p3 = por %p2793_p2, %p2792_p1 }
  0x2b   :  { %p2795_p4 = pnand %p2794_p3, %p2788_p0 }
  0x2d   :  { %2798 = shalt.err (!%p2795_p4)
}
  0x2e   :  { %28 = dma.hbm_to_vmem [thread:$0]  %s3415_s1, 3584, %s2905_s6, [#allocation6], %s2854_s14, %s2854_s14, %s2855_s15  }
  0x2f   :  { %s2856_s27 = smov [#allocation10]   ;;  %s2799_s7 = scalar_lea.hbm %s3417_s3, 2048 }
  0x30   :  { %s46_s28 = sshll.u32 %s2856_s27, 4  ;;  %p2800_p5 = scmp.ne.s32.totalorder %s3417_s3, %s2799_s7  ;;  %s47_s28 = int_to_ptr.vmem [resolvable:$true] %s46_s28 }
  0x31   :  { %p2803_p6 = scmp.lt.u32.totalorder %s2799_s7, %s3417_s3 }
  0x33   :  { %p2805_p7 = pnand %p2803_p6, %p2800_p5 }
  0x35   :  { %2808 = shalt.err (!%p2805_p7)
}
  0x36   :  { %s2809_s0 = scalar_lea.vmem %s47_s28, 2048  ;;  %p2814_p9 = scmp.lt.s32.totalorder %s47_s28, %s47_s28 }
  0x37   :  { %p2810_p8 = scmp.ne.s32.totalorder %s47_s28, %s2809_s0  ;;  %p2815_p10 = scmp.lt.s32.totalorder %s2809_s0, %s2809_s0 }
  0x39   :  { %p2816_p11 = por %p2815_p10, %p2814_p9 }
  0x3b   :  { %p2817_p12 = pnand %p2816_p11, %p2810_p8 }
  0x3d   :  { %2820 = shalt.err (!%p2817_p12)
}
  0x3e   :  { %s2857_s1 = smov 128   ;;  %s2858_s6 = smov 8  }
  0x3f   :  { %52 = dma.hbm_to_vmem [thread:$0]  %s3417_s3, 2048, %s47_s28, [#allocation9], %s2857_s1, %s2857_s1, %s2858_s6  }
  0x40   :  { %2845 = dma.done.wait [#allocation6], 3584  }
  0x41   :  { %2846 = vsyncadd [#allocation6], 4294963712 }
  0x42   :  { %2847 = dma.done.wait [#allocation9], 10240  }
  0x43   :  { %2848 = vsyncadd [#allocation9], 4294957056  ;;  %v2859_v0 = vmov 0.0   ;;  %v308_v1 = vld [vmem:[#allocation8 + $0x8] sm:$0xff]  ;;  %v307_v3 = vld [vmem:[#allocation8] sm:$0xff]  ;;  %s2984_s3 = sld [smem:[#allocation4]]  ;;  %v106_v55 = vlaneseq }
  0x44   :  { %439 = vmatprep.mubr.f32.mxu0 %v2859_v0  ;;  %64 = vst [vmem:[#allocation2] sm:$0xff] %v2859_v0  ;;  %65 = vst [vmem:[#allocation2 + $0x8] sm:$0xff] %v2859_v0  ;;  %510 = vmatprep.mubr.f32.mxu1 %v2859_v0  ;;  %v312_v2 = vld [vmem:[#allocation8 + $0x28] sm:$0xff]  ;;  %v311_v5 = vld [vmem:[#allocation8 + $0x20] sm:$0xff]  ;;  %s2990_s14 = sld [smem:[#allocation4 + $0x80]]  ;;  %s1930_s25 = sld [smem:[#allocation4 + $0x1]] }
  0x45   :  { %66 = vst [vmem:[#allocation2 + $0x10] sm:$0xff] %v2859_v0  ;;  %67 = vst [vmem:[#allocation2 + $0x18] sm:$0xff] %v2859_v0  ;;  %v2982_v4 = vpack.c.bf16 %v312_v2, %v308_v1  ;;  %v316_v6 = vld [vmem:[#allocation8 + $0x48] sm:$0xff]  ;;  %v2986_v8 = vpack.c.bf16 %v311_v5, %v307_v3  ;;  %v315_v10 = vld [vmem:[#allocation8 + $0x40] sm:$0xff]  ;;  %vm3050_vm0 = vcmp.lt.s32.totalorder %v106_v55, 512  ;;  %s1954_s2 = sld [smem:[#allocation4 + $0x81]] }
  0x46   :  { %68 = vst [vmem:[#allocation2 + $0x20] sm:$0xff] %v2859_v0  ;;  %69 = vst [vmem:[#allocation2 + $0x28] sm:$0xff] %v2859_v0  ;;  %v320_v7 = vld [vmem:[#allocation8 + $0x68] sm:$0xff]  ;;  %v319_v11 = vld [vmem:[#allocation8 + $0x60] sm:$0xff]  ;;  %s1933_s0 = sld [smem:[#allocation4 + $0x2]]  ;;  %vm2861_vm1 = vmmov 0  }
  0x47   :  { %70 = vst [vmem:[#allocation2 + $0x30] sm:$0xff] %v2859_v0  ;;  %71 = vst [vmem:[#allocation2 + $0x38] sm:$0xff] %v2859_v0  ;;  %v2988_v9 = vpack.c.bf16 %v320_v7, %v316_v6  ;;  %v324_v12 = vld [vmem:[#allocation8 + $0x88] sm:$0xff]  ;;  %2069 = vmatprep.subr.bf16.mxu0 %v2982_v4  ;;  %v2994_v14 = vpack.c.bf16 %v319_v11, %v315_v10  ;;  %v323_v15 = vld [vmem:[#allocation8 + $0x80] sm:$0xff]  ;;  %s1957_s1 = sld [smem:[#allocation4 + $0x82]] }
  0x48   :  { %72 = vst [vmem:[#allocation2 + $0x40] sm:$0xff] %v2859_v0  ;;  %73 = vst [vmem:[#allocation2 + $0x48] sm:$0xff] %v2859_v0  ;;  %v328_v13 = vld [vmem:[#allocation8 + $0xa8] sm:$0xff]  ;;  %2071 = vmatpush1.bf16.msra.mxu0 %v2986_v8  ;;  %v327_v16 = vld [vmem:[#allocation8 + $0xa0] sm:$0xff] }
  0x49   :  { %74 = vst [vmem:[#allocation2 + $0x50] sm:$0xff] %v2859_v0  ;;  %75 = vst [vmem:[#allocation2 + $0x58] sm:$0xff] %v2859_v0  ;;  %2073 = vmatprep.subr.bf16.mxu0 %v2988_v9  ;;  %v2997_v17 = vpack.c.bf16 %v328_v13, %v324_v12  ;;  %v332_v18 = vld [vmem:[#allocation8 + $0xc8] sm:$0xff]  ;;  %v310_v19 = vld [vmem:[#allocation8 + $0x18] sm:$0xff]  ;;  %v3004_v26 = vpack.c.bf16 %v327_v16, %v323_v15  ;;  %s97_s15 = sshra.s32 %s2984_s3, 3  ;;  %s100_s17 = sand.u32 7, %s2984_s3 }
  0x4a   :  { %76 = vst [vmem:[#allocation2 + $0x60] sm:$0xff] %v2859_v0  ;;  %77 = vst [vmem:[#allocation2 + $0x68] sm:$0xff] %v2859_v0  ;;  %v314_v20 = vld [vmem:[#allocation8 + $0x38] sm:$0xff]  ;;  %v336_v21 = vld [vmem:[#allocation8 + $0xe8] sm:$0xff]  ;;  %s204_s16 = sshra.s32 %s2990_s14, 3  ;;  %s2000_s18 = sshll.u32 %s97_s15, 5 }
  0x4b   :  { %78 = vst [vmem:[#allocation2 + $0x70] sm:$0xff] %v2859_v0  ;;  %79 = vst [vmem:[#allocation2 + $0x78] sm:$0xff] %v2859_v0  ;;  %v2999_v22 = vpack.c.bf16 %v314_v20, %v310_v19  ;;  %v309_v23 = vld [vmem:[#allocation8 + $0x10] sm:$0xff]  ;;  %v318_v27 = vld [vmem:[#allocation8 + $0x58] sm:$0xff]  ;;  %v3008_v30 = vpack.c.bf16 %v336_v21, %v332_v18  ;;  %s207_s19 = sand.u32 7, %s2990_s14  ;;  %s2008_s20 = sshll.u32 %s204_s16, 5 }
  0x4c   :  { %80 = vst [vmem:[#allocation2 + $0x80] sm:$0xff] %v2859_v0  ;;  %81 = vst [vmem:[#allocation2 + $0x88] sm:$0xff] %v2859_v0  ;;  %v313_v24 = vld [vmem:[#allocation8 + $0x30] sm:$0xff]  ;;  %2075 = vmatpush1.bf16.msra.mxu0 %v2994_v14  ;;  %v322_v28 = vld [vmem:[#allocation8 + $0x78] sm:$0xff]  ;;  %s3034_s21 = sadd.s32 %s2000_s18, %s100_s17  ;;  %s3039_s22 = sadd.s32 %s2008_s20, %s207_s19 }
  0x4d   :  { %82 = vst [vmem:[#allocation2 + $0x90] sm:$0xff] %v2859_v0  ;;  %83 = vst [vmem:[#allocation2 + $0x98] sm:$0xff] %v2859_v0  ;;  %v3001_v25 = vpack.c.bf16 %v313_v24, %v309_v23  ;;  %2101 = vmatprep.subr.bf16.mxu1 %v2999_v22  ;;  %v317_v29 = vld [vmem:[#allocation8 + $0x50] sm:$0xff]  ;;  %2077 = vmatprep.subr.bf16.mxu0 %v2997_v17  ;;  %v331_v31 = vld [vmem:[#allocation8 + $0xc0] sm:$0xff]  ;;  %v3011_v33 = vpack.c.bf16 %v322_v28, %v318_v27  ;;  %s104_s23 = scalar_lea.vmem [#allocation5], %s3034_s21  ;;  %s211_s24 = scalar_lea.vmem [#allocation5], %s3039_s22 }
  0x4e   :  { %84 = vst [vmem:[#allocation2 + $0xa0] sm:$0xff] %v2859_v0  ;;  %85 = vst [vmem:[#allocation2 + $0xa8] sm:$0xff] %v2859_v0  ;;  %v335_v32 = vld [vmem:[#allocation8 + $0xe0] sm:$0xff]  ;;  %v321_v34 = vld [vmem:[#allocation8 + $0x70] sm:$0xff]  ;;  %s113_s26 = sshra.s32 %s1930_s25, 3  ;;  %s116_s27 = sand.u32 7, %s1930_s25 }
  0x4f   :  { %86 = vst [vmem:[#allocation2 + $0xb0] sm:$0xff] %v2859_v0  ;;  %87 = vst [vmem:[#allocation2 + $0xb8] sm:$0xff] %v2859_v0  ;;  %2103 = vmatpush1.bf16.msra.mxu1 %v3001_v25  ;;  %v340_v35 = vld [vmem:[#allocation8 + $0x108] sm:$0xff]  ;;  %v3014_v37 = vpack.c.bf16 %v321_v34, %v317_v29  ;;  %v326_v38 = vld [vmem:[#allocation8 + $0x98] sm:$0xff]  ;;  %v3019_v42 = vpack.c.bf16 %v335_v32, %v331_v31  ;;  %s2001_s28 = sshll.u32 %s113_s26, 5  ;;  %s217_s29 = sshra.s32 %s1954_s2, 3 }
  0x50   :  { %88 = vst [vmem:[#allocation2 + $0xc0] sm:$0xff] %v2859_v0  ;;  %89 = vst [vmem:[#allocation2 + $0xc8] sm:$0xff] %v2859_v0  ;;  %v344_v36 = vld [vmem:[#allocation8 + $0x128] sm:$0xff]  ;;  %2105 = vmatprep.subr.bf16.mxu1 %v3011_v33  ;;  %v330_v39 = vld [vmem:[#allocation8 + $0xb8] sm:$0xff]  ;;  %2079 = vmatpush1.bf16.msra.mxu0 %v3004_v26  ;;  %s119_s30 = sadd.s32 %s2001_s28, %s116_s27  ;;  %s220_s7 = sand.u32 7, %s1954_s2 }
  0x51   :  { %90 = vst [vmem:[#allocation2 + $0xd0] sm:$0xff] %v2859_v0  ;;  %91 = vst [vmem:[#allocation2 + $0xd8] sm:$0xff] %v2859_v0  ;;  %v325_v40 = vld [vmem:[#allocation8 + $0x90] sm:$0xff]  ;;  %v339_v43 = vld [vmem:[#allocation8 + $0x100] sm:$0xff]  ;;  %v3021_v45 = vpack.c.bf16 %v330_v39, %v326_v38  ;;  %2081 = vmatprep.subr.bf16.mxu0 %v3008_v30  ;;  %v3025_v46 = vpack.c.bf16 %v344_v36, %v340_v35  ;;  %s2009_s8 = sshll.u32 %s217_s29, 5  ;;  %s120_s9 = scalar_lea.vmem [#allocation5], %s119_s30 }
  0x52   :  { %92 = vst [vmem:[#allocation2 + $0xe0] sm:$0xff] %v2859_v0  ;;  %93 = vst [vmem:[#allocation2 + $0xe8] sm:$0xff] %v2859_v0  ;;  %v329_v41 = vld [vmem:[#allocation8 + $0xb0] sm:$0xff]  ;;  %v343_v44 = vld [vmem:[#allocation8 + $0x120] sm:$0xff]  ;;  %s223_s10 = sadd.s32 %s2009_s8, %s220_s7  ;;  %s126_s6 = sshra.s32 %s1933_s0, 3 }
  0x53   :  { %94 = vst [vmem:[#allocation2 + $0xf0] sm:$0xff] %v2859_v0  ;;  %95 = vst [vmem:[#allocation2 + $0xf8] sm:$0xff] %v2859_v0  ;;  %2107 = vmatpush1.bf16.msra.mxu1 %v3014_v37  ;;  %v348_v47 = vld [vmem:[#allocation8 + $0x148] sm:$0xff]  ;;  %v3028_v48 = vpack.c.bf16 %v329_v41, %v325_v40  ;;  %v334_v49 = vld [vmem:[#allocation8 + $0xd8] sm:$0xff]  ;;  %v3037_v56 = vpack.c.bf16 %v343_v44, %v339_v43  ;;  %s224_s11 = scalar_lea.vmem [#allocation5], %s223_s10  ;;  %s129_s12 = sand.u32 7, %s1933_s0 }
  0x54   :  { %v338_v50 = vld [vmem:[#allocation8 + $0xf8] sm:$0xff]  ;;  %v352_v51 = vld [vmem:[#allocation8 + $0x168] sm:$0xff]  ;;  %2109 = vmatprep.subr.bf16.mxu1 %v3021_v45  ;;  %v333_v53 = vld [vmem:[#allocation8 + $0xd0] sm:$0xff]  ;;  %2083 = vmatpush1.bf16.msra.mxu0 %v3019_v42  ;;  %s2002_s13 = sshll.u32 %s126_s6, 5  ;;  %s230_s3 = sshra.s32 %s1957_s1, 3 }
  0x55   :  { %v3032_v52 = vpack.c.bf16 %v338_v50, %v334_v49  ;;  %v337_v54 = vld [vmem:[#allocation8 + $0xf0] sm:$0xff]  ;;  %v342_v57 = vld [vmem:[#allocation8 + $0x118] sm:$0xff]  ;;  %2085 = vmatprep.subr.bf16.mxu0 %v3025_v46  ;;  %v3042_v59 = vpack.c.bf16 %v352_v51, %v348_v47  ;;  %v347_v60 = vld [vmem:[#allocation8 + $0x140] sm:$0xff]  ;;  %s132_s14 = sadd.s32 %s2002_s13, %s129_s12  ;;  %s233_s15 = sand.u32 7, %s1957_s1 }
  0x56   :  { %v346_v58 = vld [vmem:[#allocation8 + $0x138] sm:$0xff]  ;;  %v351_v61 = vld [vmem:[#allocation8 + $0x160] sm:$0xff]  ;;  %v356_v62 = vld [vmem:[#allocation8 + $0x188] sm:$0xff]  ;;  %v3045_v63 = vpack.c.bf16 %v337_v54, %v333_v53  ;;  %s2010_s16 = sshll.u32 %s230_s3, 5  ;;  %s133_s17 = scalar_lea.vmem [#allocation5], %s132_s14 }
  0x57   :  { %2111 = vmatpush1.bf16.msra.mxu1 %v3028_v48  ;;  %v360_v1 = vld [vmem:[#allocation8 + $0x1a8] sm:$0xff]  ;;  %v3048_v2 = vpack.c.bf16 %v346_v58, %v342_v57  ;;  %v341_v3 = vld [vmem:[#allocation8 + $0x110] sm:$0xff]  ;;  %v350_v6 = vld [vmem:[#allocation8 + $0x158] sm:$0xff]  ;;  %v3055_v11 = vpack.c.bf16 %v351_v61, %v347_v60  ;;  %s236_s18 = sadd.s32 %s2010_s16, %s233_s15  ;;  %s1936_s20 = sld [smem:[#allocation4 + $0x3]] }
  0x58   :  { %2113 = vmatprep.subr.bf16.mxu1 %v3032_v52  ;;  %v345_v5 = vld [vmem:[#allocation8 + $0x130] sm:$0xff]  ;;  %v354_v7 = vld [vmem:[#allocation8 + $0x178] sm:$0xff]  ;;  %2087 = vmatpush1.bf16.msra.mxu0 %v3037_v56  ;;  %v355_v12 = vld [vmem:[#allocation8 + $0x180] sm:$0xff]  ;;  %v3058_v15 = vpack.c.bf16 %v360_v1, %v356_v62  ;;  %s237_s19 = scalar_lea.vmem [#allocation5], %s236_s18  ;;  %s1960_s21 = sld [smem:[#allocation4 + $0x83]] }
  0x59   :  { %v359_v13 = vld [vmem:[#allocation8 + $0x1a0] sm:$0xff]  ;;  %2089 = vmatprep.subr.bf16.mxu0 %v3042_v59  ;;  %v364_v16 = vld [vmem:[#allocation8 + $0x1c8] sm:$0xff]  ;;  %v3061_v19 = vpack.c.bf16 %v345_v5, %v341_v3  ;;  %v3065_v21 = vpack.c.bf16 %v354_v7, %v350_v6  ;;  %v349_v23 = vld [vmem:[#allocation8 + $0x150] sm:$0xff]  ;;  %s1939_s7 = sld [smem:[#allocation4 + $0x4]]  ;;  %s1942_s15 = sld [smem:[#allocation4 + $0x5]] }
  0x5a   :  { %v368_v18 = vld [vmem:[#allocation8 + $0x1e8] sm:$0xff]  ;;  %v353_v24 = vld [vmem:[#allocation8 + $0x170] sm:$0xff]  ;;  %v358_v28 = vld [vmem:[#allocation8 + $0x198] sm:$0xff]  ;;  %v3073_v31 = vpack.c.bf16 %v359_v13, %v355_v12  ;;  %s1963_s8 = sld [smem:[#allocation4 + $0x84]]  ;;  %s1966_s16 = sld [smem:[#allocation4 + $0x85]] }
  0x5b   :  { %2115 = vmatpush1.bf16.msra.mxu1 %v3045_v63  ;;  %v105_v20 = vld [vmem:[%s104_s23] ss:$8 sm:$0xf]  ;;  %v3076_v32 = vpack.c.bf16 %v368_v18, %v364_v16  ;;  %v3079_v36 = vpack.c.bf16 %v353_v24, %v349_v23 }
  0x5c   :  { %2117 = vmatprep.subr.bf16.mxu1 %v3048_v2  ;;  %110 = vst.msk [vmem:[#allocation2] ss:$8 sm:$0xf] %vm3050_vm0, %v105_v20  ;;  %v212_v27 = vld [vmem:[%s211_s24] ss:$8 sm:$0xf]  ;;  %2091 = vmatpush1.bf16.msra.mxu0 %v3055_v11 }
  0x5d   :  { %v362_v29 = vld [vmem:[#allocation8 + $0x1b8] sm:$0xff]  ;;  %214 = vst.msk [vmem:[#allocation2 + $0x1] ss:$8 sm:$0xf] %vm3050_vm0, %v212_v27  ;;  %2093 = vmatprep.subr.bf16.mxu0 %v3058_v15  ;;  %v363_v34 = vld [vmem:[#allocation8 + $0x1c0] sm:$0xff]  ;;  %v357_v39 = vld [vmem:[#allocation8 + $0x190] sm:$0xff] }
  0x5e   :  { %v367_v35 = vld [vmem:[#allocation8 + $0x1e0] sm:$0xff]  ;;  %v3082_v38 = vpack.c.bf16 %v362_v29, %v358_v28  ;;  %v361_v40 = vld [vmem:[#allocation8 + $0x1b0] sm:$0xff]  ;;  %v366_v41 = vld [vmem:[#allocation8 + $0x1d8] sm:$0xff]  ;;  %s139_s22 = sshra.s32 %s1936_s20, 3  ;;  %s142_s23 = sand.u32 7, %s1936_s20 }
  0x5f   :  { %2119 = vmatpush1.bf16.msra.mxu1 %v3061_v19  ;;  %v370_v43 = vld [vmem:[#allocation8 + $0x1f8] sm:$0xff]  ;;  %v3085_v44 = vpack.c.bf16 %v367_v35, %v363_v34  ;;  %v3089_v47 = vpack.c.bf16 %v361_v40, %v357_v39  ;;  %v365_v50 = vld [vmem:[#allocation8 + $0x1d0] sm:$0xff]  ;;  %s2003_s24 = sshll.u32 %s139_s22, 5  ;;  %s243_s25 = sshra.s32 %s1960_s21, 3 }
  0x60   :  { %2121 = vmatprep.subr.bf16.mxu1 %v3065_v21  ;;  %2095 = vmatpush1.bf16.msra.mxu0 %v3073_v31  ;;  %v3092_v49 = vpack.c.bf16 %v370_v43, %v366_v41  ;;  %v369_v51 = vld [vmem:[#allocation8 + $0x1f0] sm:$0xff]  ;;  %s145_s2 = sadd.s32 %s2003_s24, %s142_s23  ;;  %s246_s26 = sand.u32 7, %s1960_s21 }
  0x61   :  { %2097 = vmatprep.subr.bf16.mxu0 %v3076_v32  ;;  %v3096_v53 = vpack.c.bf16 %v369_v51, %v365_v50  ;;  %v121_v54 = vld [vmem:[%s120_s9] ss:$8 sm:$0xf]  ;;  %s2011_s27 = sshll.u32 %s243_s25, 5  ;;  %s146_s28 = scalar_lea.vmem [#allocation5], %s145_s2 }
  0x62   :  { %123 = vst.msk [vmem:[#allocation2 + $0x20] ss:$8 sm:$0xf] %vm3050_vm0, %v121_v54  ;;  %v225_v55 = vld [vmem:[%s224_s11] ss:$8 sm:$0xf]  ;;  %s249_s29 = sadd.s32 %s2011_s27, %s246_s26 }
  0x63   :  { %2123 = vmatpush1.bf16.msra.mxu1 %v3079_v36  ;;  %227 = vst.msk [vmem:[#allocation2 + $0x21] ss:$8 sm:$0xf] %vm3050_vm0, %v225_v55  ;;  %s250_s30 = scalar_lea.vmem [#allocation5], %s249_s29  ;;  %s152_s9 = sshra.s32 %s1939_s7, 3 }
  0x64   :  { %2125 = vmatprep.subr.bf16.mxu1 %v3082_v38  ;;  %2099 = vmatpush1.bf16.msra.mxu0 %v3085_v44  ;;  %v371_v57 = vld [vmem:[#allocation2] sm:$0xff]  ;;  %v372_v58 = vld [vmem:[#allocation2 + $0x8] sm:$0xff]  ;;  %v374_v6 = vld [vmem:[#allocation2 + $0x18] sm:$0xff]  ;;  %s155_s10 = sand.u32 7, %s1939_s7  ;;  %s2004_s11 = sshll.u32 %s152_s9, 5 }
  0x65   :  { %2133 = vmatprep.subr.bf16.mxu0 %v2982_v4  ;;  %v373_v16 = vld [vmem:[#allocation2 + $0x10] sm:$0xff]  ;;  %s256_s0 = sshra.s32 %s1963_s8, 3  ;;  %s158_s1 = sadd.s32 %s2004_s11, %s155_s10 }
  0x66   :  { %s259_s6 = sand.u32 7, %s1963_s8  ;;  %s2012_s12 = sshll.u32 %s256_s0, 5 }
  0x67   :  { %2127 = vmatpush1.bf16.msra.mxu1 %v3089_v47  ;;  %440 = vmatmul.mubr.f32.vlgmr.msra.gmra.mrb[0].mxu0 %v2859_v0  ;;  %s159_s13 = scalar_lea.vmem [#allocation5], %s158_s1  ;;  %s262_s3 = sadd.s32 %s2012_s12, %s259_s6 }
  0x68   :  { %2129 = vmatprep.subr.bf16.mxu1 %v3092_v49  ;;  %2135 = vmatpush1.bf16.msra.mxu0 %v2986_v8  ;;  %s263_s14 = scalar_lea.vmem [#allocation5], %s262_s3  ;;  %s168_s18 = sand.u32 7, %s1942_s15 }
  0x69   :  { %613 = vmatprep.mubr.f32.mxu0 %v2859_v0  ;;  %2137 = vmatprep.subr.bf16.mxu0 %v2988_v9  ;;  %s269_s20 = sshra.s32 %s1966_s16, 3  ;;  %s272_s22 = sand.u32 7, %s1966_s16 }
  0x6a   :  { %s2013_s23 = sshll.u32 %s269_s20, 5  ;;  %s1945_s26 = sld [smem:[#allocation4 + $0x6]] }
  0x6b   :  { %2131 = vmatpush1.bf16.msra.mxu1 %v3096_v53  ;;  %s275_s25 = sadd.s32 %s2013_s23, %s272_s22  ;;  %s1969_s27 = sld [smem:[#allocation4 + $0x86]] }
  0x6c   :  { %2165 = vmatprep.subr.bf16.mxu1 %v2999_v22  ;;  %2139 = vmatpush1.bf16.msra.mxu0 %v2994_v14  ;;  %s276_s2 = scalar_lea.vmem [#allocation5], %s275_s25  ;;  %s1948_s6 = sld [smem:[#allocation4 + $0x7]] }
  0x6d   :  { %2141 = vmatprep.subr.bf16.mxu0 %v2997_v17  ;;  %s1972_s12 = sld [smem:[#allocation4 + $0x87]] }
  0x6e   :  { %511 = vmatmul.mubr.f32.vlgmr.msra.gmra.mrb[0].mxu1 %v2859_v0 }
  0x6f   :  { %2167 = vmatpush1.bf16.msra.mxu1 %v3001_v25  ;;  %684 = vmatprep.mubr.f32.mxu1 %v2859_v0 }
  0x70   :  { %2169 = vmatprep.subr.bf16.mxu1 %v3011_v33  ;;  %2143 = vmatpush1.bf16.msra.mxu0 %v3004_v26  ;;  %s181_s29 = sand.u32 7, %s1945_s26 }
  0x71   :  { %2145 = vmatprep.subr.bf16.mxu0 %v3008_v30  ;;  %s282_s7 = sshra.s32 %s1969_s27, 3  ;;  %s285_s9 = sand.u32 7, %s1969_s27 }
  0x72   :  { %s2014_s10 = sshll.u32 %s282_s7, 5  ;;  %s194_s3 = sand.u32 7, %s1948_s6 }
  0x73   :  { %2171 = vmatpush1.bf16.msra.mxu1 %v3014_v37  ;;  %s288_s0 = sadd.s32 %s2014_s10, %s285_s9 }
  0x74   :  { %2173 = vmatprep.subr.bf16.mxu1 %v3021_v45  ;;  %2147 = vmatpush1.bf16.msra.mxu0 %v3019_v42  ;;  %s289_s1 = scalar_lea.vmem [#allocation5], %s288_s0 }
  0x75   :  { %2149 = vmatprep.subr.bf16.mxu0 %v3025_v46 }
  0x77   :  { %2175 = vmatpush1.bf16.msra.mxu1 %v3028_v48 }
  0x78   :  { %2177 = vmatprep.subr.bf16.mxu1 %v3032_v52  ;;  %2151 = vmatpush1.bf16.msra.mxu0 %v3037_v56 }
  0x79   :  { %2153 = vmatprep.subr.bf16.mxu0 %v3042_v59 }
  0x7b   :  { %2179 = vmatpush1.bf16.msra.mxu1 %v3045_v63 }
  0x7c   :  { %2181 = vmatprep.subr.bf16.mxu1 %v3048_v2  ;;  %2155 = vmatpush1.bf16.msra.mxu0 %v3055_v11 }
  0x7d   :  { %2157 = vmatprep.subr.bf16.mxu0 %v3058_v15 }
  0x7f   :  { %2183 = vmatpush1.bf16.msra.mxu1 %v3061_v19 }
  0x80   :  { %2185 = vmatprep.subr.bf16.mxu1 %v3065_v21  ;;  %2159 = vmatpush1.bf16.msra.mxu0 %v3073_v31 }
  0x81   :  { %2161 = vmatprep.subr.bf16.mxu0 %v3076_v32 }
  0x83   :  { %2187 = vmatpush1.bf16.msra.mxu1 %v3079_v36 }
  0x84   :  { %2189 = vmatprep.subr.bf16.mxu1 %v3082_v38  ;;  %2163 = vmatpush1.bf16.msra.mxu0 %v3085_v44 }
  0x85   :  { %2197 = vmatprep.subr.bf16.mxu0 %v2982_v4 }
  0x87   :  { %2191 = vmatpush1.bf16.msra.mxu1 %v3089_v47 }
  0x88   :  { %2193 = vmatprep.subr.bf16.mxu1 %v3092_v49 }
  0x8b   :  { %2195 = vmatpush1.bf16.msra.mxu1 %v3096_v53 }
  0x8c   :  { %2229 = vmatprep.subr.bf16.mxu1 %v2999_v22 }
 0x13a   :  { %v441_v60 = vpop.f32.mrb[0].mxu0 }
 0x13b   :  { %v517_v61 = vadd.f32 %v441_v60, %v371_v57  ;;  %v443_v62 = vpop.f32.mrb[1].mxu0  ;;  %v134_v57 = vld [vmem:[%s133_s17] ss:$8 sm:$0xf]  ;;  %s165_s17 = sshra.s32 %s1942_s15, 3  ;;  %s295_s15 = sshra.s32 %s1972_s12, 3 }
 0x13c   :  { %v518_v1 = vadd.f32 %v443_v62, %v372_v58  ;;  %136 = vst.msk [vmem:[#allocation2 + $0x40] ss:$8 sm:$0xf] %vm3050_vm0, %v134_v57  ;;  %v238_v58 = vld [vmem:[%s237_s19] ss:$8 sm:$0xf] }
 0x13d   :  { %v1975_v3 = vmul.f32 -1.442695, %v517_v61  ;;  %240 = vst.msk [vmem:[#allocation2 + $0x41] ss:$8 sm:$0xf] %vm3050_vm0, %v238_v58  ;;  %v545_v60 = vld [vmem:[#allocation2 + $0x20] sm:$0xff] }
 0x13e   :  { %v1976_v5 = vmul.f32 -1.442695, %v518_v1  ;;  %v546_v61 = vld [vmem:[#allocation2 + $0x28] sm:$0xff]  ;;  %s2005_s19 = sshll.u32 %s165_s17, 5  ;;  %s298_s17 = sand.u32 7, %s1972_s12 }
 0x13f   :  { %2616 = vpow2.f32 %v1975_v3  ;;  %s171_s21 = sadd.s32 %s2005_s19, %s168_s18  ;;  %s2015_s18 = sshll.u32 %s295_s15, 5 }
 0x140   :  { %2618 = vpow2.f32 %v1976_v5  ;;  %s172_s24 = scalar_lea.vmem [#allocation5], %s171_s21  ;;  %s301_s20 = sadd.s32 %s2015_s18, %s298_s17 }
 0x141   :  { %v512_v7 = vpop.f32.mrb[0].mxu1  ;;  %s302_s21 = scalar_lea.vmem [#allocation5], %s301_s20 }
 0x142   :  { %v514_v12 = vpop.f32.mrb[1].mxu1  ;;  %v519_v20 = vadd.f32 %v512_v7, %v373_v16  ;;  %v548_v16 = vld [vmem:[#allocation2 + $0x38] sm:$0xff] }
 0x143   :  { %v520_v13 = vadd.f32 %v514_v12, %v374_v6 }
 0x145   :  { %v1977_v18 = vmul.f32 -1.442695, %v520_v13 }
 0x147   :  { %2620 = vpow2.f32 %v1977_v18 }
 0x148   :  { %2622 = vtanh.f32 %v519_v20  ;;  %v547_v20 = vld [vmem:[#allocation2 + $0x30] sm:$0xff] }
 0x149   :  { %v2617_v23 = vpop.eup %2616 }
 0x14a   :  { %v2619_v24 = vpop.eup %2618  ;;  %v524_v27 = vadd.f32 1.0, %v2617_v23 }
 0x14b   :  { %v530_v28 = vadd.f32 1.0, %v2619_v24 }
 0x14c   :  { %2624 = vrcp.f32 %v524_v27 }
 0x14d   :  { %2626 = vrcp.f32 %v530_v28 }
 0x151   :  { %v2621_v29 = vpop.eup %2620 }
 0x152   :  { %v2623_v34 = vpop.eup %2622  ;;  %v537_v39 = vadd.f32 1.0, %v2621_v29 }
 0x154   :  { %2628 = vrcp.f32 %v537_v39 }
 0x156   :  { %v2625_v35 = vpop.eup %2624 }
 0x157   :  { %v2627_v40 = vpop.eup %2626  ;;  %v541_v41 = vmul.f32 %v2625_v35, %v2623_v34 }
 0x158   :  { %v540_v43 = vmul.f32 0.0, %v2627_v40 }
 0x15a   :  { %v3142_v50 = vadd.f32 %v541_v41, %v540_v43 }
 0x15c   :  { %2630 = vtanh.f32 %v3142_v50 }
 0x15e   :  { %v2629_v51 = vpop.eup %2628 }
 0x166   :  { %v2631_v54 = vpop.eup %2630 }
 0x167   :  { %v544_v55 = vmul.f32 %v2631_v54, %v2629_v51 }
 0x169   :  { %614 = vmatmul.mubr.f32.vlgmr.msra.gmra.mrb[2].mxu0 %v544_v55  ;;  %685 = vmatmul.mubr.f32.vlgmr.msra.gmra.mrb[2].mxu1 %v544_v55 }
 0x16a   :  { %2199 = vmatpush1.bf16.msra.mxu0 %v2986_v8  ;;  %2231 = vmatpush1.bf16.msra.mxu1 %v3001_v25 }
 0x16b   :  { %2201 = vmatprep.subr.bf16.mxu0 %v2988_v9  ;;  %2233 = vmatprep.subr.bf16.mxu1 %v3011_v33 }
 0x16c   :  { %787 = vmatprep.mubr.f32.mxu0 %v2859_v0  ;;  %858 = vmatprep.mubr.f32.mxu1 %v2859_v0 }
 0x16e   :  { %2203 = vmatpush1.bf16.msra.mxu0 %v2994_v14  ;;  %2235 = vmatpush1.bf16.msra.mxu1 %v3014_v37 }
 0x16f   :  { %2205 = vmatprep.subr.bf16.mxu0 %v2997_v17  ;;  %2237 = vmatprep.subr.bf16.mxu1 %v3021_v45 }
 0x172   :  { %2207 = vmatpush1.bf16.msra.mxu0 %v3004_v26  ;;  %2239 = vmatpush1.bf16.msra.mxu1 %v3028_v48 }
 0x173   :  { %2209 = vmatprep.subr.bf16.mxu0 %v3008_v30  ;;  %2241 = vmatprep.subr.bf16.mxu1 %v3032_v52 }
 0x176   :  { %2211 = vmatpush1.bf16.msra.mxu0 %v3019_v42  ;;  %2243 = vmatpush1.bf16.msra.mxu1 %v3045_v63 }
 0x177   :  { %2213 = vmatprep.subr.bf16.mxu0 %v3025_v46  ;;  %2245 = vmatprep.subr.bf16.mxu1 %v3048_v2 }
 0x17a   :  { %2215 = vmatpush1.bf16.msra.mxu0 %v3037_v56  ;;  %2247 = vmatpush1.bf16.msra.mxu1 %v3061_v19 }
 0x17b   :  { %2217 = vmatprep.subr.bf16.mxu0 %v3042_v59  ;;  %2249 = vmatprep.subr.bf16.mxu1 %v3065_v21 }
 0x17e   :  { %2219 = vmatpush1.bf16.msra.mxu0 %v3055_v11  ;;  %2251 = vmatpush1.bf16.msra.mxu1 %v3079_v36 }
 0x17f   :  { %2221 = vmatprep.subr.bf16.mxu0 %v3058_v15  ;;  %2253 = vmatprep.subr.bf16.mxu1 %v3082_v38 }
 0x182   :  { %2223 = vmatpush1.bf16.msra.mxu0 %v3073_v31  ;;  %2255 = vmatpush1.bf16.msra.mxu1 %v3089_v47 }
 0x183   :  { %2225 = vmatprep.subr.bf16.mxu0 %v3076_v32  ;;  %2257 = vmatprep.subr.bf16.mxu1 %v3092_v49 }
 0x186   :  { %2227 = vmatpush1.bf16.msra.mxu0 %v3085_v44  ;;  %2259 = vmatpush1.bf16.msra.mxu1 %v3096_v53 }
 0x187   :  { %2261 = vmatprep.subr.bf16.mxu0 %v2982_v4  ;;  %2293 = vmatprep.subr.bf16.mxu1 %v2999_v22 }
 0x23c   :  { %v615_v62 = vpop.f32.mrb[2].mxu0  ;;  %v686_v1 = vpop.f32.mrb[2].mxu1 }
 0x23d   :  { %v691_v3 = vadd.f32 %v615_v62, %v545_v60  ;;  %v617_v5 = vpop.f32.mrb[3].mxu0  ;;  %v688_v6 = vpop.f32.mrb[3].mxu1  ;;  %v693_v24 = vadd.f32 %v686_v1, %v547_v20  ;;  %v719_v62 = vld [vmem:[#allocation2 + $0x40] sm:$0xff]  ;;  %v720_v1 = vld [vmem:[#allocation2 + $0x48] sm:$0xff]  ;;  %v722_v20 = vld [vmem:[#allocation2 + $0x58] sm:$0xff] }
 0x23e   :  { %v692_v7 = vadd.f32 %v617_v5, %v546_v61  ;;  %v694_v18 = vadd.f32 %v688_v6, %v548_v16  ;;  %v251_v61 = vld [vmem:[%s250_s30] ss:$8 sm:$0xf] }
 0x23f   :  { %v1978_v12 = vmul.f32 -1.442695, %v691_v3  ;;  %253 = vst.msk [vmem:[#allocation2 + $0x61] ss:$8 sm:$0xf] %vm3050_vm0, %v251_v61 }
 0x240   :  { %v1979_v13 = vmul.f32 -1.442695, %v692_v7  ;;  %v1980_v23 = vmul.f32 -1.442695, %v694_v18 }
 0x241   :  { %2632 = vpow2.f32 %v1978_v12 }
 0x242   :  { %2634 = vpow2.f32 %v1979_v13 }
 0x243   :  { %2636 = vpow2.f32 %v1980_v23 }
 0x244   :  { %2638 = vtanh.f32 %v693_v24  ;;  %v721_v24 = vld [vmem:[#allocation2 + $0x50] sm:$0xff] }
 0x24b   :  { %v2633_v27 = vpop.eup %2632 }
 0x24c   :  { %v2635_v28 = vpop.eup %2634  ;;  %v698_v29 = vadd.f32 1.0, %v2633_v27 }
 0x24d   :  { %v704_v34 = vadd.f32 1.0, %v2635_v28  ;;  %v2637_v35 = vpop.eup %2636 }
 0x24e   :  { %2640 = vrcp.f32 %v698_v29  ;;  %v2639_v39 = vpop.eup %2638  ;;  %v711_v51 = vadd.f32 1.0, %v2637_v35 }
 0x24f   :  { %2642 = vrcp.f32 %v704_v34 }
 0x250   :  { %2644 = vrcp.f32 %v711_v51 }
 0x258   :  { %v2641_v40 = vpop.eup %2640 }
 0x259   :  { %v2643_v41 = vpop.eup %2642  ;;  %v715_v43 = vmul.f32 %v2641_v40, %v2639_v39 }
 0x25a   :  { %v714_v54 = vmul.f32 %v2643_v41, %v3142_v50  ;;  %v2645_v57 = vpop.eup %2644  ;;  %v147_v50 = vld [vmem:[%s146_s28] ss:$8 sm:$0xf]  ;;  %s178_s28 = sshra.s32 %s1945_s26, 3 }
 0x25b   :  { %149 = vst.msk [vmem:[#allocation2 + $0x60] ss:$8 sm:$0xf] %vm3050_vm0, %v147_v50  ;;  %s2006_s30 = sshll.u32 %s178_s28, 5 }
 0x25c   :  { %v3184_v55 = vadd.f32 %v715_v43, %v714_v54  ;;  %s184_s8 = sadd.s32 %s2006_s30, %s181_s29 }
 0x25d   :  { %s185_s11 = scalar_lea.vmem [#allocation5], %s184_s8 }
 0x25e   :  { %2646 = vtanh.f32 %v3184_v55 }
 0x268   :  { %v2647_v58 = vpop.eup %2646 }
 0x269   :  { %v718_v60 = vmul.f32 %v2647_v58, %v2645_v57 }
 0x26b   :  { %788 = vmatmul.mubr.f32.vlgmr.msra.gmra.mrb[4].mxu0 %v718_v60  ;;  %859 = vmatmul.mubr.f32.vlgmr.msra.gmra.mrb[4].mxu1 %v718_v60 }
 0x26c   :  { %2263 = vmatpush1.bf16.msra.mxu0 %v2986_v8  ;;  %2295 = vmatpush1.bf16.msra.mxu1 %v3001_v25 }
 0x26d   :  { %2265 = vmatprep.subr.bf16.mxu0 %v2988_v9  ;;  %2297 = vmatprep.subr.bf16.mxu1 %v3011_v33 }
 0x26e   :  { %961 = vmatprep.mubr.f32.mxu0 %v2859_v0  ;;  %1032 = vmatprep.mubr.f32.mxu1 %v2859_v0 }
 0x270   :  { %2267 = vmatpush1.bf16.msra.mxu0 %v2994_v14  ;;  %2299 = vmatpush1.bf16.msra.mxu1 %v3014_v37 }
 0x271   :  { %2269 = vmatprep.subr.bf16.mxu0 %v2997_v17  ;;  %2301 = vmatprep.subr.bf16.mxu1 %v3021_v45 }
 0x274   :  { %2271 = vmatpush1.bf16.msra.mxu0 %v3004_v26  ;;  %2303 = vmatpush1.bf16.msra.mxu1 %v3028_v48 }
 0x275   :  { %2273 = vmatprep.subr.bf16.mxu0 %v3008_v30  ;;  %2305 = vmatprep.subr.bf16.mxu1 %v3032_v52 }
 0x278   :  { %2275 = vmatpush1.bf16.msra.mxu0 %v3019_v42  ;;  %2307 = vmatpush1.bf16.msra.mxu1 %v3045_v63 }
 0x279   :  { %2277 = vmatprep.subr.bf16.mxu0 %v3025_v46  ;;  %2309 = vmatprep.subr.bf16.mxu1 %v3048_v2 }
 0x27c   :  { %2279 = vmatpush1.bf16.msra.mxu0 %v3037_v56  ;;  %2311 = vmatpush1.bf16.msra.mxu1 %v3061_v19 }
 0x27d   :  { %2281 = vmatprep.subr.bf16.mxu0 %v3042_v59  ;;  %2313 = vmatprep.subr.bf16.mxu1 %v3065_v21 }
 0x280   :  { %2283 = vmatpush1.bf16.msra.mxu0 %v3055_v11  ;;  %2315 = vmatpush1.bf16.msra.mxu1 %v3079_v36 }
 0x281   :  { %2285 = vmatprep.subr.bf16.mxu0 %v3058_v15  ;;  %2317 = vmatprep.subr.bf16.mxu1 %v3082_v38 }
 0x284   :  { %2287 = vmatpush1.bf16.msra.mxu0 %v3073_v31  ;;  %2319 = vmatpush1.bf16.msra.mxu1 %v3089_v47 }
 0x285   :  { %2289 = vmatprep.subr.bf16.mxu0 %v3076_v32  ;;  %2321 = vmatprep.subr.bf16.mxu1 %v3092_v49 }
 0x288   :  { %2291 = vmatpush1.bf16.msra.mxu0 %v3085_v44  ;;  %2323 = vmatpush1.bf16.msra.mxu1 %v3096_v53 }
 0x289   :  { %2325 = vmatprep.subr.bf16.mxu0 %v2982_v4  ;;  %2357 = vmatprep.subr.bf16.mxu1 %v2999_v22 }
 0x33e   :  { %v789_v3 = vpop.f32.mrb[4].mxu0  ;;  %v860_v5 = vpop.f32.mrb[4].mxu1 }
 0x33f   :  { %v865_v6 = vadd.f32 %v789_v3, %v719_v62  ;;  %v791_v7 = vpop.f32.mrb[5].mxu0  ;;  %v862_v12 = vpop.f32.mrb[5].mxu1  ;;  %v867_v28 = vadd.f32 %v860_v5, %v721_v24  ;;  %v894_v3 = vld [vmem:[#allocation2 + $0x68] sm:$0xff] }
 0x340   :  { %v866_v13 = vadd.f32 %v791_v7, %v720_v1  ;;  %v868_v23 = vadd.f32 %v862_v12, %v722_v20  ;;  %v893_v1 = vld [vmem:[#allocation2 + $0x60] sm:$0xff] }
 0x341   :  { %v1981_v16 = vmul.f32 -1.442695, %v865_v6 }
 0x342   :  { %v1982_v18 = vmul.f32 -1.442695, %v866_v13  ;;  %v1983_v27 = vmul.f32 -1.442695, %v868_v23  ;;  %v896_v23 = vld [vmem:[#allocation2 + $0x78] sm:$0xff] }
 0x343   :  { %2648 = vpow2.f32 %v1981_v16 }
 0x344   :  { %2650 = vpow2.f32 %v1982_v18 }
 0x345   :  { %2652 = vpow2.f32 %v1983_v27  ;;  %v895_v27 = vld [vmem:[#allocation2 + $0x70] sm:$0xff] }
 0x346   :  { %2654 = vtanh.f32 %v867_v28 }
 0x34d   :  { %v2649_v29 = vpop.eup %2648 }
 0x34e   :  { %v2651_v34 = vpop.eup %2650  ;;  %v872_v35 = vadd.f32 1.0, %v2649_v29 }
 0x34f   :  { %v878_v39 = vadd.f32 1.0, %v2651_v34  ;;  %v2653_v40 = vpop.eup %2652 }
 0x350   :  { %2656 = vrcp.f32 %v872_v35  ;;  %v2655_v41 = vpop.eup %2654  ;;  %v885_v57 = vadd.f32 1.0, %v2653_v40 }
 0x351   :  { %2658 = vrcp.f32 %v878_v39 }
 0x352   :  { %2660 = vrcp.f32 %v885_v57 }
 0x35a   :  { %v2657_v43 = vpop.eup %2656 }
 0x35b   :  { %v2659_v51 = vpop.eup %2658  ;;  %v889_v54 = vmul.f32 %v2657_v43, %v2655_v41 }
 0x35c   :  { %v888_v58 = vmul.f32 %v2659_v51, %v3184_v55  ;;  %v2661_v50 = vpop.eup %2660  ;;  %v264_v55 = vld [vmem:[%s263_s14] ss:$8 sm:$0xf] }
 0x35d   :  { %266 = vst.msk [vmem:[#allocation2 + $0x81] ss:$8 sm:$0xf] %vm3050_vm0, %v264_v55 }
 0x35e   :  { %v3226_v60 = vadd.f32 %v889_v54, %v888_v58 }
 0x360   :  { %2662 = vtanh.f32 %v3226_v60 }
 0x36a   :  { %v2663_v61 = vpop.eup %2662 }
 0x36b   :  { %v892_v62 = vmul.f32 %v2663_v61, %v2661_v50 }
 0x36d   :  { %962 = vmatmul.mubr.f32.vlgmr.msra.gmra.mrb[6].mxu0 %v892_v62  ;;  %1033 = vmatmul.mubr.f32.vlgmr.msra.gmra.mrb[6].mxu1 %v892_v62 }
 0x36e   :  { %2327 = vmatpush1.bf16.msra.mxu0 %v2986_v8  ;;  %2359 = vmatpush1.bf16.msra.mxu1 %v3001_v25 }
 0x36f   :  { %2329 = vmatprep.subr.bf16.mxu0 %v2988_v9  ;;  %2361 = vmatprep.subr.bf16.mxu1 %v3011_v33 }
 0x370   :  { %1135 = vmatprep.mubr.f32.mxu0 %v2859_v0  ;;  %1206 = vmatprep.mubr.f32.mxu1 %v2859_v0  ;;  %v160_v0 = vld [vmem:[%s159_s13] ss:$8 sm:$0xf]  ;;  %s191_s13 = sshra.s32 %s1948_s6, 3 }
 0x371   :  { %162 = vst.msk [vmem:[#allocation2 + $0x80] ss:$8 sm:$0xf] %vm3050_vm0, %v160_v0  ;;  %s2007_s14 = sshll.u32 %s191_s13, 5 }
 0x372   :  { %2331 = vmatpush1.bf16.msra.mxu0 %v2994_v14  ;;  %2363 = vmatpush1.bf16.msra.mxu1 %v3014_v37  ;;  %s197_s16 = sadd.s32 %s2007_s14, %s194_s3 }
 0x373   :  { %2333 = vmatprep.subr.bf16.mxu0 %v2997_v17  ;;  %2365 = vmatprep.subr.bf16.mxu1 %v3021_v45  ;;  %s198_s19 = scalar_lea.vmem [#allocation5], %s197_s16 }
 0x376   :  { %2335 = vmatpush1.bf16.msra.mxu0 %v3004_v26  ;;  %2367 = vmatpush1.bf16.msra.mxu1 %v3028_v48 }
 0x377   :  { %2337 = vmatprep.subr.bf16.mxu0 %v3008_v30  ;;  %2369 = vmatprep.subr.bf16.mxu1 %v3032_v52 }
 0x37a   :  { %2339 = vmatpush1.bf16.msra.mxu0 %v3019_v42  ;;  %2371 = vmatpush1.bf16.msra.mxu1 %v3045_v63 }
 0x37b   :  { %2341 = vmatprep.subr.bf16.mxu0 %v3025_v46  ;;  %2373 = vmatprep.subr.bf16.mxu1 %v3048_v2 }
 0x37e   :  { %2343 = vmatpush1.bf16.msra.mxu0 %v3037_v56  ;;  %2375 = vmatpush1.bf16.msra.mxu1 %v3061_v19 }
 0x37f   :  { %2345 = vmatprep.subr.bf16.mxu0 %v3042_v59  ;;  %2377 = vmatprep.subr.bf16.mxu1 %v3065_v21 }
 0x382   :  { %2347 = vmatpush1.bf16.msra.mxu0 %v3055_v11  ;;  %2379 = vmatpush1.bf16.msra.mxu1 %v3079_v36 }
 0x383   :  { %2349 = vmatprep.subr.bf16.mxu0 %v3058_v15  ;;  %2381 = vmatprep.subr.bf16.mxu1 %v3082_v38 }
 0x386   :  { %2351 = vmatpush1.bf16.msra.mxu0 %v3073_v31  ;;  %2383 = vmatpush1.bf16.msra.mxu1 %v3089_v47 }
 0x387   :  { %2353 = vmatprep.subr.bf16.mxu0 %v3076_v32  ;;  %2385 = vmatprep.subr.bf16.mxu1 %v3092_v49 }
 0x38a   :  { %2355 = vmatpush1.bf16.msra.mxu0 %v3085_v44  ;;  %2387 = vmatpush1.bf16.msra.mxu1 %v3096_v53 }
 0x38b   :  { %2389 = vmatprep.subr.bf16.mxu0 %v2982_v4  ;;  %2421 = vmatprep.subr.bf16.mxu1 %v2999_v22 }
 0x440   :  { %v963_v5 = vpop.f32.mrb[6].mxu0  ;;  %v1034_v6 = vpop.f32.mrb[6].mxu1 }
 0x441   :  { %v1039_v7 = vadd.f32 %v963_v5, %v893_v1  ;;  %v965_v12 = vpop.f32.mrb[7].mxu0  ;;  %v1036_v13 = vpop.f32.mrb[7].mxu1  ;;  %v1041_v29 = vadd.f32 %v1034_v6, %v895_v27  ;;  %v3275_v1 = vld [vmem:[#allocation2 + $0xa0] sm:$0xff]  ;;  %v1068_v6 = vld [vmem:[#allocation2 + $0x88] sm:$0xff]  ;;  %v1070_v27 = vld [vmem:[#allocation2 + $0x98] sm:$0xff] }
 0x442   :  { %v1040_v16 = vadd.f32 %v965_v12, %v894_v3  ;;  %v1042_v24 = vadd.f32 %v1036_v13, %v896_v23  ;;  %v277_v3 = vld [vmem:[%s276_s2] ss:$8 sm:$0xf] }
 0x443   :  { %v1984_v18 = vmul.f32 -1.442695, %v1039_v7  ;;  %279 = vst.msk [vmem:[#allocation2 + $0xa1] ss:$8 sm:$0xf] %vm3050_vm0, %v277_v3  ;;  %v1067_v5 = vld [vmem:[#allocation2 + $0x80] sm:$0xff] }
 0x444   :  { %v1985_v20 = vmul.f32 -1.442695, %v1040_v16  ;;  %v1986_v28 = vmul.f32 -1.442695, %v1042_v24 }
 0x445   :  { %2664 = vpow2.f32 %v1984_v18 }
 0x446   :  { %2666 = vpow2.f32 %v1985_v20 }
 0x447   :  { %2668 = vpow2.f32 %v1986_v28 }
 0x448   :  { %2670 = vtanh.f32 %v1041_v29  ;;  %v1069_v29 = vld [vmem:[#allocation2 + $0x90] sm:$0xff] }
 0x44f   :  { %v2665_v34 = vpop.eup %2664 }
 0x450   :  { %v2667_v35 = vpop.eup %2666  ;;  %v1046_v39 = vadd.f32 1.0, %v2665_v34 }
 0x451   :  { %v1052_v40 = vadd.f32 1.0, %v2667_v35  ;;  %v2669_v41 = vpop.eup %2668 }
 0x452   :  { %2672 = vrcp.f32 %v1046_v39  ;;  %v2671_v43 = vpop.eup %2670  ;;  %v1059_v58 = vadd.f32 1.0, %v2669_v41 }
 0x453   :  { %2674 = vrcp.f32 %v1052_v40 }
 0x454   :  { %2676 = vrcp.f32 %v1059_v58 }
 0x45c   :  { %v2673_v51 = vpop.eup %2672 }
 0x45d   :  { %v2675_v54 = vpop.eup %2674  ;;  %v1063_v57 = vmul.f32 %v2673_v51, %v2671_v43 }
 0x45e   :  { %v1062_v50 = vmul.f32 %v2675_v54, %v3226_v60  ;;  %v2677_v62 = vpop.eup %2676  ;;  %v173_v60 = vld [vmem:[%s172_s24] ss:$8 sm:$0xf]  ;;  %s2862_s24 = smov [#allocation11]  }
 0x45f   :  { %175 = vst.msk [vmem:[#allocation2 + $0xa0] ss:$8 sm:$0xf] %vm3050_vm0, %v173_v60  ;;  %s1863_s25 = sshll.u32 %s2862_s24, 4  ;;  %s1864_s25 = int_to_ptr.vmem [resolvable:$true] %s1863_s25 }
 0x460   :  { %v3268_v61 = vadd.f32 %v1063_v57, %v1062_v50  ;;  %s2821_s2 = scalar_lea.vmem %s1864_s25, 128  ;;  %p2826_p0 = scmp.lt.s32.totalorder %s1864_s25, %s1864_s25 }
 0x461   :  { %p2822_p13 = scmp.ne.s32.totalorder %s1864_s25, %s2821_s2  ;;  %p2827_p1 = scmp.lt.s32.totalorder %s2821_s2, %s2821_s2 }
 0x462   :  { %2678 = vtanh.f32 %v3268_v61 }
 0x463   :  { %p2828_p2 = por %p2827_p1, %p2826_p0 }
 0x465   :  { %p2829_p3 = pnand %p2828_p2, %p2822_p13 }
 0x46c   :  { %v2679_v0 = vpop.eup %2678 }
 0x46d   :  { %v1066_v55 = vmul.f32 %v2679_v0, %v2677_v62 }
 0x46f   :  { %1136 = vmatmul.mubr.f32.vlgmr.msra.gmra.mrb[8].mxu0 %v1066_v55  ;;  %1207 = vmatmul.mubr.f32.vlgmr.msra.gmra.mrb[8].mxu1 %v1066_v55 }
 0x470   :  { %2391 = vmatpush1.bf16.msra.mxu0 %v2986_v8  ;;  %2423 = vmatpush1.bf16.msra.mxu1 %v3001_v25 }
 0x471   :  { %2393 = vmatprep.subr.bf16.mxu0 %v2988_v9  ;;  %2425 = vmatprep.subr.bf16.mxu1 %v3011_v33 }
 0x472   :  { %1309 = vmatprep.mubr.f32.mxu0 %v3275_v1  ;;  %1380 = vmatprep.mubr.f32.mxu1 %v3275_v1 }
 0x474   :  { %2395 = vmatpush1.bf16.msra.mxu0 %v2994_v14  ;;  %2427 = vmatpush1.bf16.msra.mxu1 %v3014_v37 }
 0x475   :  { %2397 = vmatprep.subr.bf16.mxu0 %v2997_v17  ;;  %2429 = vmatprep.subr.bf16.mxu1 %v3021_v45 }
 0x478   :  { %2399 = vmatpush1.bf16.msra.mxu0 %v3004_v26  ;;  %2431 = vmatpush1.bf16.msra.mxu1 %v3028_v48 }
 0x479   :  { %2401 = vmatprep.subr.bf16.mxu0 %v3008_v30  ;;  %2433 = vmatprep.subr.bf16.mxu1 %v3032_v52 }
 0x47c   :  { %2403 = vmatpush1.bf16.msra.mxu0 %v3019_v42  ;;  %2435 = vmatpush1.bf16.msra.mxu1 %v3045_v63 }
 0x47d   :  { %2405 = vmatprep.subr.bf16.mxu0 %v3025_v46  ;;  %2437 = vmatprep.subr.bf16.mxu1 %v3048_v2 }
 0x480   :  { %2407 = vmatpush1.bf16.msra.mxu0 %v3037_v56  ;;  %2439 = vmatpush1.bf16.msra.mxu1 %v3061_v19 }
 0x481   :  { %2409 = vmatprep.subr.bf16.mxu0 %v3042_v59  ;;  %2441 = vmatprep.subr.bf16.mxu1 %v3065_v21 }
 0x484   :  { %2411 = vmatpush1.bf16.msra.mxu0 %v3055_v11  ;;  %2443 = vmatpush1.bf16.msra.mxu1 %v3079_v36 }
 0x485   :  { %2413 = vmatprep.subr.bf16.mxu0 %v3058_v15  ;;  %2445 = vmatprep.subr.bf16.mxu1 %v3082_v38 }
 0x488   :  { %2415 = vmatpush1.bf16.msra.mxu0 %v3073_v31  ;;  %2447 = vmatpush1.bf16.msra.mxu1 %v3089_v47 }
 0x489   :  { %2417 = vmatprep.subr.bf16.mxu0 %v3076_v32  ;;  %2449 = vmatprep.subr.bf16.mxu1 %v3092_v49 }
 0x48c   :  { %2419 = vmatpush1.bf16.msra.mxu0 %v3085_v44  ;;  %2451 = vmatpush1.bf16.msra.mxu1 %v3096_v53 }
 0x48d   :  { %2453 = vmatprep.subr.bf16.mxu0 %v2982_v4  ;;  %2485 = vmatprep.subr.bf16.mxu1 %v2999_v22 }
 0x542   :  { %v1137_v7 = vpop.f32.mrb[8].mxu0  ;;  %v1208_v12 = vpop.f32.mrb[8].mxu1 }
 0x543   :  { %v1213_v13 = vadd.f32 %v1137_v7, %v1067_v5  ;;  %v1139_v16 = vpop.f32.mrb[9].mxu0  ;;  %v1210_v18 = vpop.f32.mrb[9].mxu1  ;;  %v1215_v35 = vadd.f32 %v1208_v12, %v1069_v29  ;;  %v1243_v29 = vld [vmem:[#allocation2 + $0xb0] sm:$0xff] }
 0x544   :  { %v1214_v20 = vadd.f32 %v1139_v16, %v1068_v6  ;;  %v1216_v28 = vadd.f32 %v1210_v18, %v1070_v27  ;;  %v290_v6 = vld [vmem:[%s289_s1] ss:$8 sm:$0xf] }
 0x545   :  { %v1987_v23 = vmul.f32 -1.442695, %v1213_v13  ;;  %292 = vst.msk [vmem:[#allocation2 + $0xc1] ss:$8 sm:$0xf] %vm3050_vm0, %v290_v6  ;;  %v1244_v27 = vld [vmem:[#allocation2 + $0xb8] sm:$0xff] }
 0x546   :  { %v1988_v24 = vmul.f32 -1.442695, %v1214_v20  ;;  %v1989_v34 = vmul.f32 -1.442695, %v1216_v28  ;;  %v1763_v6 = vld [vmem:[#allocation10] sm:$0xff] }
 0x547   :  { %2680 = vpow2.f32 %v1987_v23 }
 0x548   :  { %2682 = vpow2.f32 %v1988_v24 }
 0x549   :  { %2684 = vpow2.f32 %v1989_v34 }
 0x54a   :  { %2686 = vtanh.f32 %v1215_v35 }
 0x551   :  { %v2681_v39 = vpop.eup %2680 }
 0x552   :  { %v2683_v40 = vpop.eup %2682  ;;  %v1220_v41 = vadd.f32 1.0, %v2681_v39 }
 0x553   :  { %v1226_v43 = vadd.f32 1.0, %v2683_v40  ;;  %v2685_v51 = vpop.eup %2684 }
 0x554   :  { %2688 = vrcp.f32 %v1220_v41  ;;  %v2687_v54 = vpop.eup %2686  ;;  %v1233_v62 = vadd.f32 1.0, %v2685_v51 }
 0x555   :  { %2690 = vrcp.f32 %v1226_v43 }
 0x556   :  { %2692 = vrcp.f32 %v1233_v62 }
 0x55e   :  { %v2689_v57 = vpop.eup %2688 }
 0x55f   :  { %v2691_v58 = vpop.eup %2690  ;;  %v1237_v50 = vmul.f32 %v2689_v57, %v2687_v54 }
 0x560   :  { %v1236_v0 = vmul.f32 %v2691_v58, %v3268_v61  ;;  %v2693_v60 = vpop.eup %2692  ;;  %v186_v61 = vld [vmem:[%s185_s11] ss:$8 sm:$0xf] }
 0x561   :  { %188 = vst.msk [vmem:[#allocation2 + $0xc0] ss:$8 sm:$0xf] %vm3050_vm0, %v186_v61 }
 0x562   :  { %v3312_v55 = vadd.f32 %v1237_v50, %v1236_v0 }
 0x564   :  { %2694 = vtanh.f32 %v3312_v55 }
 0x56e   :  { %v2695_v3 = vpop.eup %2694 }
 0x56f   :  { %v1240_v5 = vmul.f32 %v2695_v3, %v2693_v60 }
 0x571   :  { %1310 = vmatmul.mubr.f32.vlgmr.msra.gmra.mrb[10].mxu0 %v1240_v5  ;;  %1381 = vmatmul.mubr.f32.vlgmr.msra.gmra.mrb[10].mxu1 %v1240_v5 }
 0x572   :  { %2455 = vmatpush1.bf16.msra.mxu0 %v2986_v8  ;;  %2487 = vmatpush1.bf16.msra.mxu1 %v3001_v25 }
 0x573   :  { %2457 = vmatprep.subr.bf16.mxu0 %v2988_v9  ;;  %2489 = vmatprep.subr.bf16.mxu1 %v3011_v33 }
 0x574   :  { %1483 = vmatprep.mubr.f32.mxu0 %v3275_v1  ;;  %1554 = vmatprep.mubr.f32.mxu1 %v3275_v1 }
 0x576   :  { %2459 = vmatpush1.bf16.msra.mxu0 %v2994_v14  ;;  %2491 = vmatpush1.bf16.msra.mxu1 %v3014_v37 }
 0x577   :  { %2461 = vmatprep.subr.bf16.mxu0 %v2997_v17  ;;  %2493 = vmatprep.subr.bf16.mxu1 %v3021_v45 }
 0x57a   :  { %2463 = vmatpush1.bf16.msra.mxu0 %v3004_v26  ;;  %2495 = vmatpush1.bf16.msra.mxu1 %v3028_v48 }
 0x57b   :  { %2465 = vmatprep.subr.bf16.mxu0 %v3008_v30  ;;  %2497 = vmatprep.subr.bf16.mxu1 %v3032_v52 }
 0x57e   :  { %2467 = vmatpush1.bf16.msra.mxu0 %v3019_v42  ;;  %2499 = vmatpush1.bf16.msra.mxu1 %v3045_v63 }
 0x57f   :  { %2469 = vmatprep.subr.bf16.mxu0 %v3025_v46  ;;  %2501 = vmatprep.subr.bf16.mxu1 %v3048_v2 }
 0x582   :  { %2471 = vmatpush1.bf16.msra.mxu0 %v3037_v56  ;;  %2503 = vmatpush1.bf16.msra.mxu1 %v3061_v19 }
 0x583   :  { %2473 = vmatprep.subr.bf16.mxu0 %v3042_v59  ;;  %2505 = vmatprep.subr.bf16.mxu1 %v3065_v21 }
 0x586   :  { %2475 = vmatpush1.bf16.msra.mxu0 %v3055_v11  ;;  %2507 = vmatpush1.bf16.msra.mxu1 %v3079_v36 }
 0x587   :  { %2477 = vmatprep.subr.bf16.mxu0 %v3058_v15  ;;  %2509 = vmatprep.subr.bf16.mxu1 %v3082_v38 }
 0x58a   :  { %2479 = vmatpush1.bf16.msra.mxu0 %v3073_v31  ;;  %2511 = vmatpush1.bf16.msra.mxu1 %v3089_v47 }
 0x58b   :  { %2481 = vmatprep.subr.bf16.mxu0 %v3076_v32  ;;  %2513 = vmatprep.subr.bf16.mxu1 %v3092_v49 }
 0x58e   :  { %2483 = vmatpush1.bf16.msra.mxu0 %v3085_v44  ;;  %2515 = vmatpush1.bf16.msra.mxu1 %v3096_v53 }
 0x58f   :  { %2517 = vmatprep.subr.bf16.mxu0 %v2982_v4  ;;  %2549 = vmatprep.subr.bf16.mxu1 %v2999_v22  ;;  %v1241_v4 = vld [vmem:[#allocation2 + $0xa0] sm:$0xff]  ;;  %v1242_v22 = vld [vmem:[#allocation2 + $0xa8] sm:$0xff] }
 0x644   :  { %v1311_v7 = vpop.f32.mrb[10].mxu0  ;;  %v1382_v12 = vpop.f32.mrb[10].mxu1 }
 0x645   :  { %v1387_v13 = vadd.f32 %v1311_v7, %v1241_v4  ;;  %v1313_v16 = vpop.f32.mrb[11].mxu0  ;;  %v1384_v18 = vpop.f32.mrb[11].mxu1  ;;  %v1389_v35 = vadd.f32 %v1382_v12, %v1243_v29  ;;  %v1764_v4 = vld [vmem:[#allocation10 + $0x8] sm:$0xff]  ;;  %v2860_v7 = vmov 0.0|0.0   ;;  %v1765_v12 = vld [vmem:[#allocation10 + $0x10] sm:$0xff]  ;;  %v1771_v29 = vld [vmem:[#allocation10 + $0x40] sm:$0xff] }
 0x646   :  { %v1388_v20 = vadd.f32 %v1313_v16, %v1242_v22  ;;  %v1390_v28 = vadd.f32 %v1384_v18, %v1244_v27  ;;  %v2581_v22 = vpack.c.bf16 %v1764_v4, %v1763_v6  ;;  %v1767_v18 = vld [vmem:[#allocation10 + $0x20] sm:$0xff]  ;;  %v1770_v27 = vld [vmem:[#allocation10 + $0x38] sm:$0xff] }
 0x647   :  { %v1990_v23 = vmul.f32 -1.442695, %v1387_v13  ;;  %v1766_v13 = vld [vmem:[#allocation10 + $0x18] sm:$0xff] }
 0x648   :  { %v1991_v24 = vmul.f32 -1.442695, %v1388_v20  ;;  %v1992_v34 = vmul.f32 -1.442695, %v1390_v28  ;;  %v2584_v16 = vpack.c.bf16 %v1766_v13, %v1765_v12  ;;  %v1768_v20 = vld [vmem:[#allocation10 + $0x28] sm:$0xff] }
 0x649   :  { %2696 = vpow2.f32 %v1990_v23  ;;  %v2587_v23 = vpack.c.bf16 %v1768_v20, %v1767_v18 }
 0x64a   :  { %2698 = vpow2.f32 %v1991_v24  ;;  %v1769_v24 = vld [vmem:[#allocation10 + $0x30] sm:$0xff] }
 0x64b   :  { %2700 = vpow2.f32 %v1992_v34  ;;  %v2590_v28 = vpack.c.bf16 %v1770_v27, %v1769_v24  ;;  %v1772_v34 = vld [vmem:[#allocation10 + $0x48] sm:$0xff] }
 0x64c   :  { %2702 = vtanh.f32 %v1389_v35  ;;  %v2593_v35 = vpack.c.bf16 %v1772_v34, %v1771_v29 }
 0x653   :  { %v2697_v39 = vpop.eup %2696 }
 0x654   :  { %v2699_v40 = vpop.eup %2698  ;;  %v1394_v41 = vadd.f32 1.0, %v2697_v39  ;;  %v1773_v39 = vld [vmem:[#allocation10 + $0x50] sm:$0xff] }
 0x655   :  { %v1400_v43 = vadd.f32 1.0, %v2699_v40  ;;  %v2701_v51 = vpop.eup %2700  ;;  %v1774_v40 = vld [vmem:[#allocation10 + $0x58] sm:$0xff] }
 0x656   :  { %2704 = vrcp.f32 %v1394_v41  ;;  %v2703_v54 = vpop.eup %2702  ;;  %v1407_v62 = vadd.f32 1.0, %v2701_v51  ;;  %v1775_v41 = vld [vmem:[#allocation10 + $0x60] sm:$0xff]  ;;  %v1776_v51 = vld [vmem:[#allocation10 + $0x68] sm:$0xff] }
 0x657   :  { %2706 = vrcp.f32 %v1400_v43  ;;  %v2596_v43 = vpack.c.bf16 %v1774_v40, %v1773_v39 }
 0x658   :  { %2708 = vrcp.f32 %v1407_v62 }
 0x660   :  { %v2705_v57 = vpop.eup %2704 }
 0x661   :  { %v2707_v58 = vpop.eup %2706  ;;  %v1411_v50 = vmul.f32 %v2705_v57, %v2703_v54  ;;  %v2599_v54 = vpack.c.bf16 %v1776_v51, %v1775_v41  ;;  %v1777_v57 = vld [vmem:[#allocation10 + $0x70] sm:$0xff] }
 0x662   :  { %v1410_v0 = vmul.f32 %v2707_v58, %v3312_v55  ;;  %v2709_v3 = vpop.eup %2708  ;;  %v1778_v58 = vld [vmem:[#allocation10 + $0x78] sm:$0xff] }
 0x664   :  { %v3354_v60 = vadd.f32 %v1411_v50, %v1410_v0  ;;  %v2602_v50 = vpack.c.bf16 %v1778_v58, %v1777_v57 }
 0x666   :  { %2710 = vtanh.f32 %v3354_v60 }
 0x670   :  { %v2711_v5 = vpop.eup %2710 }
 0x671   :  { %v1414_v61 = vmul.f32 %v2711_v5, %v2709_v3 }
 0x673   :  { %1484 = vmatmul.mubr.f32.vlgmr.msra.gmra.mrb[12].mxu0 %v1414_v61  ;;  %1555 = vmatmul.mubr.f32.vlgmr.msra.gmra.mrb[12].mxu1 %v1414_v61 }
 0x674   :  { %2519 = vmatpush1.bf16.msra.mxu0 %v2986_v8  ;;  %2551 = vmatpush1.bf16.msra.mxu1 %v3001_v25  ;;  %v199_v8 = vld [vmem:[%s198_s19] ss:$8 sm:$0xf] }
 0x675   :  { %2521 = vmatprep.subr.bf16.mxu0 %v2988_v9  ;;  %2553 = vmatprep.subr.bf16.mxu1 %v3011_v33  ;;  %201 = vst.msk [vmem:[#allocation2 + $0xe0] ss:$8 sm:$0xf] %vm3050_vm0, %v199_v8  ;;  %v303_v9 = vld [vmem:[%s302_s21] ss:$8 sm:$0xf] }
 0x676   :  { %1657 = vmatprep.mubr.f32.mxu0 %v3275_v1  ;;  %1728 = vmatprep.mubr.f32.mxu1 %v3275_v1  ;;  %305 = vst.msk [vmem:[#allocation2 + $0xe1] ss:$8 sm:$0xf] %vm3050_vm0, %v303_v9 }
 0x678   :  { %2523 = vmatpush1.bf16.msra.mxu0 %v2994_v14  ;;  %2555 = vmatpush1.bf16.msra.mxu1 %v3014_v37  ;;  %v1415_v14 = vld [vmem:[#allocation2 + $0xc0] sm:$0xff] }
 0x679   :  { %2525 = vmatprep.subr.bf16.mxu0 %v2997_v17  ;;  %2557 = vmatprep.subr.bf16.mxu1 %v3021_v45  ;;  %v1416_v17 = vld [vmem:[#allocation2 + $0xc8] sm:$0xff] }
 0x67c   :  { %2527 = vmatpush1.bf16.msra.mxu0 %v3004_v26  ;;  %2559 = vmatpush1.bf16.msra.mxu1 %v3028_v48  ;;  %v1418_v48 = vld [vmem:[#allocation2 + $0xd8] sm:$0xff] }
 0x67d   :  { %2529 = vmatprep.subr.bf16.mxu0 %v3008_v30  ;;  %2561 = vmatprep.subr.bf16.mxu1 %v3032_v52  ;;  %v1589_v62 = vld [vmem:[#allocation2 + $0xe0] sm:$0xff]  ;;  %v1590_v0 = vld [vmem:[#allocation2 + $0xe8] sm:$0xff] }
 0x680   :  { %2531 = vmatpush1.bf16.msra.mxu0 %v3019_v42  ;;  %2563 = vmatpush1.bf16.msra.mxu1 %v3045_v63 }
 0x681   :  { %2533 = vmatprep.subr.bf16.mxu0 %v3025_v46  ;;  %2565 = vmatprep.subr.bf16.mxu1 %v3048_v2 }
 0x684   :  { %2535 = vmatpush1.bf16.msra.mxu0 %v3037_v56  ;;  %2567 = vmatpush1.bf16.msra.mxu1 %v3061_v19  ;;  %v1417_v56 = vld [vmem:[#allocation2 + $0xd0] sm:$0xff] }
 0x685   :  { %2537 = vmatprep.subr.bf16.mxu0 %v3042_v59  ;;  %2569 = vmatprep.subr.bf16.mxu1 %v3065_v21 }
 0x688   :  { %2539 = vmatpush1.bf16.msra.mxu0 %v3055_v11  ;;  %2571 = vmatpush1.bf16.msra.mxu1 %v3079_v36 }
 0x689   :  { %2541 = vmatprep.subr.bf16.mxu0 %v3058_v15  ;;  %2573 = vmatprep.subr.bf16.mxu1 %v3082_v38 }
 0x68c   :  { %2543 = vmatpush1.bf16.msra.mxu0 %v3073_v31  ;;  %2575 = vmatpush1.bf16.msra.mxu1 %v3089_v47 }
 0x68d   :  { %2545 = vmatprep.subr.bf16.mxu0 %v3076_v32  ;;  %2577 = vmatprep.subr.bf16.mxu1 %v3092_v49 }
 0x690   :  { %2547 = vmatpush1.bf16.msra.mxu0 %v3085_v44  ;;  %2579 = vmatpush1.bf16.msra.mxu1 %v3096_v53 }
 0x691   :  { %2580 = vmatprep.subr.bf16.mxu0 %v2860_v7 }
 0x746   :  { %v1485_v25 = vpop.f32.mrb[12].mxu0  ;;  %v1556_v26 = vpop.f32.mrb[12].mxu1 }
 0x747   :  { %v1561_v30 = vadd.f32 %v1485_v25, %v1415_v14  ;;  %v1487_v33 = vpop.f32.mrb[13].mxu0  ;;  %v1558_v37 = vpop.f32.mrb[13].mxu1  ;;  %v1563_v63 = vadd.f32 %v1556_v26, %v1417_v56  ;;  %v1591_v26 = vld [vmem:[#allocation2 + $0xf0] sm:$0xff] }
 0x748   :  { %v1562_v42 = vadd.f32 %v1487_v33, %v1416_v17  ;;  %v1564_v52 = vadd.f32 %v1558_v37, %v1418_v48 }
 0x749   :  { %v1993_v45 = vmul.f32 -1.442695, %v1561_v30 }
 0x74a   :  { %v1994_v46 = vmul.f32 -1.442695, %v1562_v42  ;;  %v1995_v59 = vmul.f32 -1.442695, %v1564_v52 }
 0x74b   :  { %2712 = vpow2.f32 %v1993_v45 }
 0x74c   :  { %2714 = vpow2.f32 %v1994_v46 }
 0x74d   :  { %2716 = vpow2.f32 %v1995_v59 }
 0x74e   :  { %2718 = vtanh.f32 %v1563_v63 }
 0x755   :  { %v2713_v2 = vpop.eup %2712 }
 0x756   :  { %v2715_v10 = vpop.eup %2714  ;;  %v1568_v11 = vadd.f32 1.0, %v2713_v2 }
 0x757   :  { %v1574_v15 = vadd.f32 1.0, %v2715_v10  ;;  %v2717_v19 = vpop.eup %2716 }
 0x758   :  { %2720 = vrcp.f32 %v1568_v11  ;;  %v2719_v21 = vpop.eup %2718  ;;  %v1581_v38 = vadd.f32 1.0, %v2717_v19 }
 0x759   :  { %2722 = vrcp.f32 %v1574_v15 }
 0x75a   :  { %2724 = vrcp.f32 %v1581_v38 }
 0x762   :  { %v2721_v31 = vpop.eup %2720 }
 0x763   :  { %v2723_v32 = vpop.eup %2722  ;;  %v1585_v36 = vmul.f32 %v2721_v31, %v2719_v21  ;;  %v1999_v31 = vld [vmem:[%s3418_s4] ss:$0 sm:$0xff] }
 0x764   :  { %v1584_v44 = vmul.f32 %v2723_v32, %v3354_v60  ;;  %v2725_v49 = vpop.eup %2724 }
 0x766   :  { %v3394_v47 = vadd.f32 %v1585_v36, %v1584_v44 }
 0x768   :  { %2726 = vtanh.f32 %v3394_v47 }
 0x772   :  { %v2727_v53 = vpop.eup %2726 }
 0x773   :  { %v1588_v55 = vmul.f32 %v2727_v53, %v2725_v49 }
 0x775   :  { %1658 = vmatmul.mubr.f32.vlgmr.msra.gmra.mrb[14].mxu0 %v1588_v55  ;;  %1729 = vmatmul.mubr.f32.vlgmr.msra.gmra.mrb[14].mxu1 %v1588_v55 }
 0x776   :  { %2582 = vmatpush3.bf16.msra.mxu0 %v2581_v22  ;;  %2065 = vmatprep.mubr.msk.f32.mxu0 %vm2861_vm1, %v3275_v1  ;;  %v1592_v1 = vld [vmem:[#allocation2 + $0xf8] sm:$0xff] }
 0x777   :  { %2583 = vmatprep.subr.bf16.mxu0 %v2860_v7 }
 0x77a   :  { %2585 = vmatpush3.bf16.msra.mxu0 %v2584_v16 }
 0x77b   :  { %2586 = vmatprep.subr.bf16.mxu0 %v2860_v7 }
 0x77e   :  { %2588 = vmatpush3.bf16.msra.mxu0 %v2587_v23 }
 0x77f   :  { %2589 = vmatprep.subr.bf16.mxu0 %v2860_v7 }
 0x782   :  { %2591 = vmatpush3.bf16.msra.mxu0 %v2590_v28 }
 0x783   :  { %2592 = vmatprep.subr.bf16.mxu0 %v2860_v7 }
 0x786   :  { %2594 = vmatpush3.bf16.msra.mxu0 %v2593_v35 }
 0x787   :  { %2595 = vmatprep.subr.bf16.mxu0 %v2860_v7 }
 0x78a   :  { %2597 = vmatpush3.bf16.msra.mxu0 %v2596_v43 }
 0x78b   :  { %2598 = vmatprep.subr.bf16.mxu0 %v2860_v7 }
 0x78e   :  { %2600 = vmatpush3.bf16.msra.mxu0 %v2599_v54 }
 0x78f   :  { %2601 = vmatprep.subr.bf16.mxu0 %v2860_v7 }
 0x792   :  { %2603 = vmatpush3.bf16.msra.mxu0 %v2602_v50 }
 0x848   :  { %v1659_v60 = vpop.f32.mrb[14].mxu0  ;;  %v1730_v3 = vpop.f32.mrb[14].mxu1 }
 0x849   :  { %v1735_v5 = vadd.f32 %v1659_v60, %v1589_v62  ;;  %v1661_v61 = vpop.f32.mrb[15].mxu0  ;;  %v1732_v8 = vpop.f32.mrb[15].mxu1  ;;  %v1737_v33 = vadd.f32 %v1730_v3, %v1591_v26 }
 0x84a   :  { %v1736_v9 = vadd.f32 %v1661_v61, %v1590_v0  ;;  %v1738_v25 = vadd.f32 %v1732_v8, %v1592_v1 }
 0x84b   :  { %v1996_v14 = vmul.f32 -1.442695, %v1735_v5 }
 0x84c   :  { %v1997_v17 = vmul.f32 -1.442695, %v1736_v9  ;;  %v1998_v30 = vmul.f32 -1.442695, %v1738_v25 }
 0x84d   :  { %2728 = vpow2.f32 %v1996_v14 }
 0x84e   :  { %2730 = vpow2.f32 %v1997_v17 }
 0x84f   :  { %2732 = vpow2.f32 %v1998_v30 }
 0x850   :  { %2734 = vtanh.f32 %v1737_v33 }
 0x857   :  { %v2729_v37 = vpop.eup %2728 }
 0x858   :  { %v2731_v42 = vpop.eup %2730  ;;  %v1742_v45 = vadd.f32 1.0, %v2729_v37 }
 0x859   :  { %v1748_v46 = vadd.f32 1.0, %v2731_v42  ;;  %v2733_v48 = vpop.eup %2732 }
 0x85a   :  { %2736 = vrcp.f32 %v1742_v45  ;;  %v2735_v52 = vpop.eup %2734  ;;  %v1755_v2 = vadd.f32 1.0, %v2733_v48 }
 0x85b   :  { %2738 = vrcp.f32 %v1748_v46 }
 0x85c   :  { %2740 = vrcp.f32 %v1755_v2 }
 0x864   :  { %v2737_v56 = vpop.eup %2736 }
 0x865   :  { %v2739_v59 = vpop.eup %2738  ;;  %v1759_v63 = vmul.f32 %v2737_v56, %v2735_v52 }
 0x866   :  { %v1758_v10 = vmul.f32 %v2739_v59, %v3394_v47  ;;  %v2741_v15 = vpop.eup %2740 }
 0x868   :  { %v1760_v11 = vadd.f32 %v1759_v63, %v1758_v10 }
 0x86a   :  { %2742 = vtanh.f32 %v1760_v11 }
 0x874   :  { %v2743_v19 = vpop.eup %2742 }
 0x875   :  { %v1762_v21 = vmul.f32 %v2743_v19, %v2741_v15 }
 0x877   :  { %2066 = vmatmul.mubr.f32.vlgmr.msra.gmra.mrb[16].mxu0 %v1762_v21 }
 0x94a   :  { %v1852_v32 = vpop.f32.mrb[16].mxu0 }
 0x94b   :  { %v1853_v36 = vadd.f32 %v1999_v31, %v1852_v32  ;;  %v2067_v38 = vpop.f32.mrb[17].mxu0 }
 0x94d   :  { %1856 = vst [vmem:[#allocation11] sm:$0xff] %v1853_v36 }
 0x94e   :  { %2832 = shalt.err (!%p2829_p3)
}
 0x94f   :  { %s2833_s28 = scalar_lea.hbm %s3419_s5, 128 }
 0x950   :  { %p2834_p4 = scmp.ne.s32.totalorder %s3419_s5, %s2833_s28  ;;  %p2837_p5 = scmp.lt.u32.totalorder %s2833_s28, %s3419_s5 }
 0x952   :  { %p2839_p6 = pnand %p2837_p5, %p2834_p4 }
 0x954   :  { %2842 = shalt.err (!%p2839_p6)
}
 0x955   :  { %1866 = dma.vmem_to_hbm [thread:$0]  %s1864_s25, 128, %s3419_s5, [#allocation7]  }
 0x956   :  { %2849 = dma.done.wait [#allocation7], 128  }
 0x957   :  { %2850 = vsyncadd [#allocation7], 4294967168 }
 0x958   :  { %1870 = vsyncpa [#allocation6], 1 }
 0x959   :  { %1871 = vsyncpa [#allocation9], 1 }
 0x95a   :  { %1872 = vsyncpa [#allocation7], 1 }

</bundles_post_ra>
